<compile_context>
chip_gen: v7x
topology: tpu7x:2x2x1
jax: 0.10.0
libtpu: 0.0.40
codegen_flags: <defaults>
</compile_context>

<pallas_src>
import math

import jax
import jax.numpy as jnp
from jax import lax
from jax.experimental import pallas as pl
from jax.experimental.pallas import tpu as pltpu

# ----------------------- small synthetic config ------------------------
B, S = 2, 8            # batch, seq_len
H = 64                 # hidden_size
N_HEADS = 4            # num_attention_heads
N_KV = 2               # num_key_value_heads
HEAD_DIM = 32          # head_dim
INTER = 128            # intermediate_size
EPS = 1e-6             # rms_norm_eps
ROPE_THETA = 10000.0
SCALE = 1.0 / math.sqrt(HEAD_DIM)
N_REP = N_HEADS // N_KV
BS = B * S             # batch folded into rows


# ----------------------------- kernel ----------------------------------
def _rmsnorm(x, w_row):
    # x: (BS, H) f32, w_row: (1, H) f32  --  Gemma: x/rms(x) * (1 + w)
    var = jnp.mean(x * x, axis=-1, keepdims=True)
    return x * lax.rsqrt(var + EPS) * (1.0 + w_row)


def _gelu_tanh(x):
    c = math.sqrt(2.0 / math.pi)
    return 0.5 * x * (1.0 + jnp.tanh(c * (x + 0.044715 * x * x * x)))


def _rope(t, cos, sin, rot):
    """Rotary embedding for all heads at once.

    rotate_half(x) == x @ rot with a constant +/-1 permutation matrix, so the
    rotation runs on the MXU instead of lane slicing/concat on the VPU path.
    t: (G, BS, HEAD_DIM) f32, cos/sin: (BS, HEAD_DIM), rot: (HEAD_DIM, HEAD_DIM).
    """
    g = t.shape[0]
    rot_b = jnp.broadcast_to(rot, (g,) + rot.shape)
    r = jnp.einsum('gsd,gde->gse', t, rot_b, preferred_element_type=jnp.float32)
    return t * cos[None] + r * sin[None]


def decoder_layer_kernel(x_ref, cos_ref, sin_ref, mask_ref, rot_ref,
                         w_in_ref, w_post_ref,
                         wq_ref, wk_ref, wv_ref, wo_ref,
                         wg_ref, wu_ref, wd_ref,
                         out_ref):
    f32 = jnp.float32
    bf16 = jnp.bfloat16

    x = x_ref[...]          # (BS, H) f32
    cos = cos_ref[...]      # (BS, HEAD_DIM)
    sin = sin_ref[...]      # (BS, HEAD_DIM)
    mask = mask_ref[...]    # (BS, BS) additive block-diagonal mask
    rot = rot_ref[...]      # (HEAD_DIM, HEAD_DIM) rotate_half matrix

    # ---------------- input RMSNorm (f32, VPU/EUP) ----------------
    xn = _rmsnorm(x, w_in_ref[...])
    xnb = xn.astype(bf16)

    # ---------------- batched QKV projections (bf16 MXU, f32 acc) ---------
    xq = jnp.broadcast_to(xnb[None], (N_HEADS, BS, H))
    xkv = jnp.broadcast_to(xnb[None], (N_KV, BS, H))
    q = jnp.einsum('hsk,hkd->hsd', xq, wq_ref[...], preferred_element_type=f32)
    k = jnp.einsum('gsk,gkd->gsd', xkv, wk_ref[...], preferred_element_type=f32)
    v = jnp.einsum('gsk,gkd->gsd', xkv, wv_ref[...], preferred_element_type=f32)

    # ---------------- RoPE on all heads in one shot (f32) -----------------
    q = _rope(q, cos, sin, rot)                 # (N_HEADS, BS, HEAD_DIM)
    k = _rope(k, cos, sin, rot)                 # (N_KV,    BS, HEAD_DIM)

    # ---------------- GQA expand: head h -> kv head h // N_REP ------------
    kr = jnp.broadcast_to(k[:, None], (N_KV, N_REP, BS, HEAD_DIM)
                          ).reshape(N_HEADS, BS, HEAD_DIM)
    vr = jnp.broadcast_to(v[:, None], (N_KV, N_REP, BS, HEAD_DIM)
                          ).reshape(N_HEADS, BS, HEAD_DIM)

    # ---------------- attention: one batched matmul + one fused softmax ---
    s = jnp.einsum('hqd,hkd->hqk', q.astype(bf16), kr.astype(bf16),
                   preferred_element_type=f32) * SCALE
    s = s + mask[None]
    m = jnp.max(s, axis=-1, keepdims=True)
    p = jnp.exp(s - m)
    denom = jnp.sum(p, axis=-1, keepdims=True)
    p = p * pl.reciprocal(denom, approx=True)   # divide -> EUP reciprocal
    # TODO(synk): attention_dropout is p=0.0 / eval mode => identity, omitted.

    ctx = jnp.einsum('hqk,hkd->hqd', p.astype(bf16), vr.astype(bf16),
                     preferred_element_type=f32)            # (N_HEADS, BS, HEAD_DIM)

    # ---------------- o_proj: batched per-head matmul, then head-sum ------
    o = jnp.einsum('hqd,hdk->hqk', ctx.astype(bf16), wo_ref[...],
                   preferred_element_type=f32)              # (N_HEADS, BS, H)
    attn = jnp.sum(o, axis=0)                               # (BS, H)

    h1 = x + attn  # residual

    # ---------------- post-attention RMSNorm + gated-GELU MLP -------------
    h1n = _rmsnorm(h1, w_post_ref[...])
    h1b = h1n.astype(bf16)
    gate = jnp.dot(h1b, wg_ref[...], preferred_element_type=f32)
    up = jnp.dot(h1b, wu_ref[...], preferred_element_type=f32)
    act = _gelu_tanh(gate) * up
    mlp = jnp.dot(act.astype(bf16), wd_ref[...], preferred_element_type=f32)

    out_ref[...] = h1 + mlp  # second residual


# ----------------------------- wrapper ----------------------------------
def gemma_decoder_layer(x, cos, sin, mask, params):
    """x: (B, S, H) f32; cos/sin: (S, HEAD_DIM) (shared across batch);
    mask: (B, S, S) additive attention mask; params are the Linear weights
    pre-transposed to (in_features, out_features), f32."""
    (w_in, w_post, wq, wk, wv, wo, wg, wu, wd) = params
    bf16 = jnp.bfloat16

    # fold batch into the row (sublane) dim: single kernel invocation
    x2 = x.reshape(BS, H)

    # cos/sin identical across batch -> tile once to (BS, HEAD_DIM)
    cos_t = jnp.tile(cos, (B, 1)).astype(jnp.float32)
    sin_t = jnp.tile(sin, (B, 1)).astype(jnp.float32)

    # block-diagonal additive mask: batch b's (S,S) mask on the diagonal,
    # -1e9 between different batches (keeps batches independent).
    blocks = jnp.where(jnp.eye(B, dtype=bool)[:, None, :, None],
                       mask[:, :, None, :], -1e9)
    mask_bd = blocks.reshape(BS, BS).astype(jnp.float32)

    # rotate_half as a constant +/-1 matrix: rotate_half(x) == x @ rot
    half = HEAD_DIM // 2
    idx = jnp.arange(half)
    rot = jnp.zeros((HEAD_DIM, HEAD_DIM), jnp.float32)
    rot = rot.at[idx, idx + half].set(1.0)
    rot = rot.at[idx + half, idx].set(-1.0)

    # head-major weight layouts, cast to bf16 for the MXU (f32 accumulation)
    wq3 = wq.reshape(H, N_HEADS, HEAD_DIM).transpose(1, 0, 2).astype(bf16)
    wk3 = wk.reshape(H, N_KV, HEAD_DIM).transpose(1, 0, 2).astype(bf16)
    wv3 = wv.reshape(H, N_KV, HEAD_DIM).transpose(1, 0, 2).astype(bf16)
    wo3 = wo.reshape(N_HEADS, HEAD_DIM, H).astype(bf16)

    vmem = pl.BlockSpec(memory_space=pltpu.MemorySpace.VMEM)
    out = pl.pallas_call(
        decoder_layer_kernel,
        out_shape=jax.ShapeDtypeStruct((BS, H), jnp.float32),
        in_specs=[vmem] * 14,
        out_specs=vmem,
    )(x2, cos_t, sin_t, mask_bd, rot,
      w_in.astype(jnp.float32), w_post.astype(jnp.float32),
      wq3, wk3, wv3, wo3,
      wg.astype(bf16), wu.astype(bf16), wd.astype(bf16))

    return out.reshape(B, S, H)


# ------------------------- pure-JAX reference ----------------------------
def ref_decoder_layer(x, cos, sin, mask, params):
    (w_in, w_post, wq, wk, wv, wo, wg, wu, wd) = params

    def rms(xx, w):
        var = jnp.mean(xx * xx, axis=-1, keepdims=True)
        return xx * lax.rsqrt(var + EPS) * (1.0 + w)

    def rot(t):
        half = t.shape[-1] // 2
        return jnp.concatenate([-t[..., half:], t[..., :half]], axis=-1)

    xn = rms(x, w_in)
    q = (xn @ wq).reshape(B, S, N_HEADS, HEAD_DIM).transpose(0, 2, 1, 3)
    k = (xn @ wk).reshape(B, S, N_KV, HEAD_DIM).transpose(0, 2, 1, 3)
    v = (xn @ wv).reshape(B, S, N_KV, HEAD_DIM).transpose(0, 2, 1, 3)

    cos_e = cos[None, None]   # (1, 1, S, HEAD_DIM)
    sin_e = sin[None, None]
    q = q * cos_e + rot(q) * sin_e
    k = k * cos_e + rot(k) * sin_e

    k = jnp.repeat(k, N_REP, axis=1)
    v = jnp.repeat(v, N_REP, axis=1)

    scores = jnp.einsum('bhqd,bhkd->bhqk', q, k) * SCALE + mask[:, None]
    p = jax.nn.softmax(scores.astype(jnp.float32), axis=-1)
    attn = jnp.einsum('bhqk,bhkd->bhqd', p, v)
    attn = attn.transpose(0, 2, 1, 3).reshape(B, S, N_HEADS * HEAD_DIM) @ wo

    h1 = x + attn
    h1n = rms(h1, w_post)
    mlp = (jax.nn.gelu(h1n @ wg, approximate=True) * (h1n @ wu)) @ wd
    return h1 + mlp


# ------------------------------- main ------------------------------------
if __name__ == "__main__":
    key = jax.random.PRNGKey(0)
    keys = jax.random.split(key, 12)

    x = jax.random.normal(keys[0], (B, S, H), dtype=jnp.float32)

    # Linear weights (stored transposed: (in, out)), small std for stability.
    wq = 0.05 * jax.random.normal(keys[1], (H, N_HEADS * HEAD_DIM), jnp.float32)
    wk = 0.05 * jax.random.normal(keys[2], (H, N_KV * HEAD_DIM), jnp.float32)
    wv = 0.05 * jax.random.normal(keys[3], (H, N_KV * HEAD_DIM), jnp.float32)
    wo = 0.05 * jax.random.normal(keys[4], (N_HEADS * HEAD_DIM, H), jnp.float32)
    wg = 0.05 * jax.random.normal(keys[5], (H, INTER), jnp.float32)
    wu = 0.05 * jax.random.normal(keys[6], (H, INTER), jnp.float32)
    wd = 0.05 * jax.random.normal(keys[7], (INTER, H), jnp.float32)
    # RMSNorm weights (torch init is zeros; small values exercise the (1+w) path)
    w_in = 0.1 * jax.random.normal(keys[8], (1, H), jnp.float32)
    w_post = 0.1 * jax.random.normal(keys[9], (1, H), jnp.float32)
    params = (w_in, w_post, wq, wk, wv, wo, wg, wu, wd)

    # Rotary embeddings (GemmaRotaryEmbedding) -- identical across batch.
    pos = jnp.arange(S, dtype=jnp.float32)
    inv_freq = 1.0 / (ROPE_THETA ** (jnp.arange(0, HEAD_DIM, 2, dtype=jnp.float32) / HEAD_DIM))
    freqs = pos[:, None] * inv_freq[None, :]
    emb = jnp.concatenate([freqs, freqs], axis=-1)            # (S, HEAD_DIM)
    cos = jnp.cos(emb)
    sin = jnp.sin(emb)

    # Causal additive attention mask (module asserts attention_mask is not None).
    row = lax.broadcasted_iota(jnp.int32, (S, S), 0)
    col = lax.broadcasted_iota(jnp.int32, (S, S), 1)
    causal = jnp.where(col <= row, 0.0, -1e9).astype(jnp.float32)
    mask = jnp.broadcast_to(causal, (B, S, S))

    # TODO(synk): KVCache.update is stateful prefill/decode plumbing; this kernel
    # implements the stateless single-forward (no cache) path of the layer.

    out = gemma_decoder_layer(x, cos, sin, mask, params)
    out = jax.block_until_ready(out)

    ref = ref_decoder_layer(x, cos, sin, mask, params)
    err = jnp.max(jnp.abs(out - ref))
    assert out.shape == (B, S, H)
    assert jnp.allclose(out, ref, atol=2.5e-2, rtol=2.5e-2), f"max abs err {err}"

    print("KERNEL_OK")
</pallas_src>

<mosaic_0001>
module attributes {stable_mosaic.version = 11 : i64} {
  func.func @decoder_layer_kernel(%arg0: memref<16x64xf32, #tpu.memory_space<vmem>>, %arg1: memref<16x32xf32, #tpu.memory_space<vmem>>, %arg2: memref<16x32xf32, #tpu.memory_space<vmem>>, %arg3: memref<16x16xf32, #tpu.memory_space<vmem>>, %arg4: memref<32x32xf32, #tpu.memory_space<vmem>>, %arg5: memref<1x64xf32, #tpu.memory_space<vmem>>, %arg6: memref<1x64xf32, #tpu.memory_space<vmem>>, %arg7: memref<4x64x32xbf16, #tpu.memory_space<vmem>>, %arg8: memref<2x64x32xbf16, #tpu.memory_space<vmem>>, %arg9: memref<2x64x32xbf16, #tpu.memory_space<vmem>>, %arg10: memref<4x32x64xbf16, #tpu.memory_space<vmem>>, %arg11: memref<64x128xbf16, #tpu.memory_space<vmem>>, %arg12: memref<64x128xbf16, #tpu.memory_space<vmem>>, %arg13: memref<128x64xbf16, #tpu.memory_space<vmem>>, %arg14: memref<16x64xf32, #tpu.memory_space<vmem>>) attributes {dimension_semantics = [], scalar_prefetch = 0 : i64, scratch_operands = 0 : i64, tpu.core_type = #tpu.core_type<tc>} {
    %c0 = arith.constant 0 : index
    %c0_0 = arith.constant 0 : index
    %0 = vector.load %arg0[%c0, %c0_0] : memref<16x64xf32, #tpu.memory_space<vmem>>, vector<16x64xf32>
    %c0_1 = arith.constant 0 : index
    %c0_2 = arith.constant 0 : index
    %1 = vector.load %arg1[%c0_1, %c0_2] : memref<16x32xf32, #tpu.memory_space<vmem>>, vector<16x32xf32>
    %c0_3 = arith.constant 0 : index
    %c0_4 = arith.constant 0 : index
    %2 = vector.load %arg2[%c0_3, %c0_4] : memref<16x32xf32, #tpu.memory_space<vmem>>, vector<16x32xf32>
    %c0_5 = arith.constant 0 : index
    %c0_6 = arith.constant 0 : index
    %3 = vector.load %arg3[%c0_5, %c0_6] : memref<16x16xf32, #tpu.memory_space<vmem>>, vector<16x16xf32>
    %c0_7 = arith.constant 0 : index
    %c0_8 = arith.constant 0 : index
    %4 = vector.load %arg4[%c0_7, %c0_8] : memref<32x32xf32, #tpu.memory_space<vmem>>, vector<32x32xf32>
    %c0_9 = arith.constant 0 : index
    %c0_10 = arith.constant 0 : index
    %5 = vector.load %arg5[%c0_9, %c0_10] : memref<1x64xf32, #tpu.memory_space<vmem>>, vector<1x64xf32>
    %6 = arith.mulf %0, %0 : vector<16x64xf32>
    %cst = arith.constant dense<0.000000e+00> : vector<16xf32>
    %7 = vector.multi_reduction <add>, %6, %cst [1] : vector<16x64xf32> to vector<16xf32>
    %8 = vector.shape_cast %7 : vector<16xf32> to vector<16x1xf32>
    %cst_11 = arith.constant 6.400000e+01 : f32
    %9 = vector.broadcast %cst_11 : f32 to vector<16x1xf32>
    %10 = arith.divf %8, %9 : vector<16x1xf32>
    %cst_12 = arith.constant 9.99999997E-7 : f32
    %11 = vector.broadcast %cst_12 : f32 to vector<16x1xf32>
    %12 = arith.addf %10, %11 : vector<16x1xf32>
    %13 = math.rsqrt %12 : vector<16x1xf32>
    %14 = vector.broadcast %13 : vector<16x1xf32> to vector<16x64xf32>
    %15 = arith.mulf %0, %14 : vector<16x64xf32>
    %cst_13 = arith.constant 1.000000e+00 : f32
    %16 = vector.broadcast %cst_13 : f32 to vector<1x64xf32>
    %17 = arith.addf %16, %5 : vector<1x64xf32>
    %18 = vector.broadcast %17 : vector<1x64xf32> to vector<16x64xf32>
    %19 = arith.mulf %15, %18 : vector<16x64xf32>
    %20 = arith.truncf %19 : vector<16x64xf32> to vector<16x64xbf16>
    %21 = vector.shape_cast %20 : vector<16x64xbf16> to vector<1x16x64xbf16>
    %22 = vector.shape_cast %21 : vector<1x16x64xbf16> to vector<1x16x64xbf16>
    %23 = vector.broadcast %22 : vector<1x16x64xbf16> to vector<4x16x64xbf16>
    %24 = vector.shape_cast %20 : vector<16x64xbf16> to vector<1x16x64xbf16>
    %25 = vector.shape_cast %24 : vector<1x16x64xbf16> to vector<1x16x64xbf16>
    %26 = vector.broadcast %25 : vector<1x16x64xbf16> to vector<2x16x64xbf16>
    %c0_14 = arith.constant 0 : index
    %c0_15 = arith.constant 0 : index
    %c0_16 = arith.constant 0 : index
    %27 = vector.load %arg7[%c0_14, %c0_15, %c0_16] : memref<4x64x32xbf16, #tpu.memory_space<vmem>>, vector<4x64x32xbf16>
    "tpu.trace_start"() <{level = 10 : i32, message = "hsk,hkd->hsd"}> : () -> ()
    %cst_17 = arith.constant dense<0.000000e+00> : vector<4x16x32xf32>
    %28 = tpu.matmul %23, %27, %cst_17 {dimension_numbers = #tpu.dot_dimension_numbers<[2], [1], [1], [2], [0, 0, 0, 1, 1, 2], [0], [0]>} : vector<4x16x64xbf16>, vector<4x64x32xbf16>, vector<4x16x32xf32> -> vector<4x16x32xf32>
    "tpu.trace_stop"() : () -> ()
    %c0_18 = arith.constant 0 : index
    %c0_19 = arith.constant 0 : index
    %c0_20 = arith.constant 0 : index
    %29 = vector.load %arg8[%c0_18, %c0_19, %c0_20] : memref<2x64x32xbf16, #tpu.memory_space<vmem>>, vector<2x64x32xbf16>
    "tpu.trace_start"() <{level = 10 : i32, message = "gsk,gkd->gsd"}> : () -> ()
    %cst_21 = arith.constant dense<0.000000e+00> : vector<2x16x32xf32>
    %30 = tpu.matmul %26, %29, %cst_21 {dimension_numbers = #tpu.dot_dimension_numbers<[2], [1], [1], [2], [0, 0, 0, 1, 1, 2], [0], [0]>} : vector<2x16x64xbf16>, vector<2x64x32xbf16>, vector<2x16x32xf32> -> vector<2x16x32xf32>
    "tpu.trace_stop"() : () -> ()
    %c0_22 = arith.constant 0 : index
    %c0_23 = arith.constant 0 : index
    %c0_24 = arith.constant 0 : index
    %31 = vector.load %arg9[%c0_22, %c0_23, %c0_24] : memref<2x64x32xbf16, #tpu.memory_space<vmem>>, vector<2x64x32xbf16>
    "tpu.trace_start"() <{level = 10 : i32, message = "gsk,gkd->gsd"}> : () -> ()
    %cst_25 = arith.constant dense<0.000000e+00> : vector<2x16x32xf32>
    %32 = tpu.matmul %26, %31, %cst_25 {dimension_numbers = #tpu.dot_dimension_numbers<[2], [1], [1], [2], [0, 0, 0, 1, 1, 2], [0], [0]>} : vector<2x16x64xbf16>, vector<2x64x32xbf16>, vector<2x16x32xf32> -> vector<2x16x32xf32>
    "tpu.trace_stop"() : () -> ()
    %33 = vector.shape_cast %4 : vector<32x32xf32> to vector<1x32x32xf32>
    %34 = vector.broadcast %33 : vector<1x32x32xf32> to vector<4x32x32xf32>
    "tpu.trace_start"() <{level = 10 : i32, message = "gsd,gde->gse"}> : () -> ()
    %cst_26 = arith.constant dense<0.000000e+00> : vector<4x16x32xf32>
    %35 = tpu.matmul %28, %34, %cst_26 {dimension_numbers = #tpu.dot_dimension_numbers<[2], [1], [1], [2], [0, 0, 0, 1, 1, 2], [0], [0]>} : vector<4x16x32xf32>, vector<4x32x32xf32>, vector<4x16x32xf32> -> vector<4x16x32xf32>
    "tpu.trace_stop"() : () -> ()
    %36 = vector.shape_cast %1 : vector<16x32xf32> to vector<1x16x32xf32>
    %37 = vector.broadcast %36 : vector<1x16x32xf32> to vector<4x16x32xf32>
    %38 = arith.mulf %28, %37 : vector<4x16x32xf32>
    %39 = vector.shape_cast %2 : vector<16x32xf32> to vector<1x16x32xf32>
    %40 = vector.broadcast %39 : vector<1x16x32xf32> to vector<4x16x32xf32>
    %41 = arith.mulf %35, %40 : vector<4x16x32xf32>
    %42 = arith.addf %38, %41 : vector<4x16x32xf32>
    %43 = vector.shape_cast %4 : vector<32x32xf32> to vector<1x32x32xf32>
    %44 = vector.broadcast %43 : vector<1x32x32xf32> to vector<2x32x32xf32>
    "tpu.trace_start"() <{level = 10 : i32, message = "gsd,gde->gse"}> : () -> ()
    %cst_27 = arith.constant dense<0.000000e+00> : vector<2x16x32xf32>
    %45 = tpu.matmul %30, %44, %cst_27 {dimension_numbers = #tpu.dot_dimension_numbers<[2], [1], [1], [2], [0, 0, 0, 1, 1, 2], [0], [0]>} : vector<2x16x32xf32>, vector<2x32x32xf32>, vector<2x16x32xf32> -> vector<2x16x32xf32>
    "tpu.trace_stop"() : () -> ()
    %46 = vector.shape_cast %1 : vector<16x32xf32> to vector<1x16x32xf32>
    %47 = vector.broadcast %46 : vector<1x16x32xf32> to vector<2x16x32xf32>
    %48 = arith.mulf %30, %47 : vector<2x16x32xf32>
    %49 = vector.shape_cast %2 : vector<16x32xf32> to vector<1x16x32xf32>
    %50 = vector.broadcast %49 : vector<1x16x32xf32> to vector<2x16x32xf32>
    %51 = arith.mulf %45, %50 : vector<2x16x32xf32>
    %52 = arith.addf %48, %51 : vector<2x16x32xf32>
    %53 = vector.shape_cast %52 : vector<2x16x32xf32> to vector<2x1x16x32xf32>
    %54 = vector.shape_cast %53 : vector<2x1x16x32xf32> to vector<2x1x16x32xf32>
    %55 = vector.broadcast %54 : vector<2x1x16x32xf32> to vector<2x2x16x32xf32>
    %56 = vector.shape_cast %55 : vector<2x2x16x32xf32> to vector<4x16x32xf32>
    %57 = vector.shape_cast %32 : vector<2x16x32xf32> to vector<2x1x16x32xf32>
    %58 = vector.shape_cast %57 : vector<2x1x16x32xf32> to vector<2x1x16x32xf32>
    %59 = vector.broadcast %58 : vector<2x1x16x32xf32> to vector<2x2x16x32xf32>
    %60 = vector.shape_cast %59 : vector<2x2x16x32xf32> to vector<4x16x32xf32>
    %61 = arith.truncf %42 : vector<4x16x32xf32> to vector<4x16x32xbf16>
    %62 = arith.truncf %56 : vector<4x16x32xf32> to vector<4x16x32xbf16>
    "tpu.trace_start"() <{level = 10 : i32, message = "hqd,hkd->hqk"}> : () -> ()
    %cst_28 = arith.constant dense<0.000000e+00> : vector<4x16x16xf32>
    %63 = tpu.matmul %61, %62, %cst_28 {dimension_numbers = #tpu.dot_dimension_numbers<[2], [2], [1], [1], [0, 0, 0, 1, 1, 1], [0], [0]>} : vector<4x16x32xbf16>, vector<4x16x32xbf16>, vector<4x16x16xf32> -> vector<4x16x16xf32>
    "tpu.trace_stop"() : () -> ()
    %cst_29 = arith.constant 0.176776692 : f32
    %64 = vector.broadcast %cst_29 : f32 to vector<4x16x16xf32>
    %65 = arith.mulf %63, %64 : vector<4x16x16xf32>
    %66 = vector.shape_cast %3 : vector<16x16xf32> to vector<1x16x16xf32>
    %67 = vector.broadcast %66 : vector<1x16x16xf32> to vector<4x16x16xf32>
    %68 = arith.addf %65, %67 : vector<4x16x16xf32>
    %cst_30 = arith.constant dense<0xFF800000> : vector<4x16xf32>
    %69 = vector.multi_reduction <maximumf>, %68, %cst_30 [2] : vector<4x16x16xf32> to vector<4x16xf32>
    %70 = vector.shape_cast %69 : vector<4x16xf32> to vector<4x16x1xf32>
    %71 = vector.broadcast %70 : vector<4x16x1xf32> to vector<4x16x16xf32>
    %72 = arith.subf %68, %71 : vector<4x16x16xf32>
    %73 = math.exp %72 : vector<4x16x16xf32>
    %cst_31 = arith.constant dense<0.000000e+00> : vector<4x16xf32>
    %74 = vector.multi_reduction <add>, %73, %cst_31 [2] : vector<4x16x16xf32> to vector<4x16xf32>
    %75 = vector.shape_cast %74 : vector<4x16xf32> to vector<4x16x1xf32>
    %76 = tpu.reciprocal %75 {approx = true} : vector<4x16x1xf32> -> vector<4x16x1xf32>
    %77 = vector.broadcast %76 : vector<4x16x1xf32> to vector<4x16x16xf32>
    %78 = arith.mulf %73, %77 : vector<4x16x16xf32>
    %79 = arith.truncf %78 : vector<4x16x16xf32> to vector<4x16x16xbf16>
    %80 = arith.truncf %60 : vector<4x16x32xf32> to vector<4x16x32xbf16>
    "tpu.trace_start"() <{level = 10 : i32, message = "hqk,hkd->hqd"}> : () -> ()
    %cst_32 = arith.constant dense<0.000000e+00> : vector<4x16x32xf32>
    %81 = tpu.matmul %79, %80, %cst_32 {dimension_numbers = #tpu.dot_dimension_numbers<[2], [1], [1], [2], [0, 0, 0, 1, 1, 2], [0], [0]>} : vector<4x16x16xbf16>, vector<4x16x32xbf16>, vector<4x16x32xf32> -> vector<4x16x32xf32>
    "tpu.trace_stop"() : () -> ()
    %82 = arith.truncf %81 : vector<4x16x32xf32> to vector<4x16x32xbf16>
    %c0_33 = arith.constant 0 : index
    %c0_34 = arith.constant 0 : index
    %c0_35 = arith.constant 0 : index
    %83 = vector.load %arg10[%c0_33, %c0_34, %c0_35] : memref<4x32x64xbf16, #tpu.memory_space<vmem>>, vector<4x32x64xbf16>
    "tpu.trace_start"() <{level = 10 : i32, message = "hqd,hdk->hqk"}> : () -> ()
    %cst_36 = arith.constant dense<0.000000e+00> : vector<4x16x64xf32>
    %84 = tpu.matmul %82, %83, %cst_36 {dimension_numbers = #tpu.dot_dimension_numbers<[2], [1], [1], [2], [0, 0, 0, 1, 1, 2], [0], [0]>} : vector<4x16x32xbf16>, vector<4x32x64xbf16>, vector<4x16x64xf32> -> vector<4x16x64xf32>
    "tpu.trace_stop"() : () -> ()
    %cst_37 = arith.constant dense<0.000000e+00> : vector<16x64xf32>
    %85 = vector.multi_reduction <add>, %84, %cst_37 [0] : vector<4x16x64xf32> to vector<16x64xf32>
    %86 = arith.addf %0, %85 : vector<16x64xf32>
    %c0_38 = arith.constant 0 : index
    %c0_39 = arith.constant 0 : index
    %87 = vector.load %arg6[%c0_38, %c0_39] : memref<1x64xf32, #tpu.memory_space<vmem>>, vector<1x64xf32>
    %88 = arith.mulf %86, %86 : vector<16x64xf32>
    %cst_40 = arith.constant dense<0.000000e+00> : vector<16xf32>
    %89 = vector.multi_reduction <add>, %88, %cst_40 [1] : vector<16x64xf32> to vector<16xf32>
    %90 = vector.shape_cast %89 : vector<16xf32> to vector<16x1xf32>
    %cst_41 = arith.constant 6.400000e+01 : f32
    %91 = vector.broadcast %cst_41 : f32 to vector<16x1xf32>
    %92 = arith.divf %90, %91 : vector<16x1xf32>
    %cst_42 = arith.constant 9.99999997E-7 : f32
    %93 = vector.broadcast %cst_42 : f32 to vector<16x1xf32>
    %94 = arith.addf %92, %93 : vector<16x1xf32>
    %95 = math.rsqrt %94 : vector<16x1xf32>
    %96 = vector.broadcast %95 : vector<16x1xf32> to vector<16x64xf32>
    %97 = arith.mulf %86, %96 : vector<16x64xf32>
    %cst_43 = arith.constant 1.000000e+00 : f32
    %98 = vector.broadcast %cst_43 : f32 to vector<1x64xf32>
    %99 = arith.addf %98, %87 : vector<1x64xf32>
    %100 = vector.broadcast %99 : vector<1x64xf32> to vector<16x64xf32>
    %101 = arith.mulf %97, %100 : vector<16x64xf32>
    %102 = arith.truncf %101 : vector<16x64xf32> to vector<16x64xbf16>
    %c0_44 = arith.constant 0 : index
    %c0_45 = arith.constant 0 : index
    %103 = vector.load %arg11[%c0_44, %c0_45] : memref<64x128xbf16, #tpu.memory_space<vmem>>, vector<64x128xbf16>
    %cst_46 = arith.constant dense<0.000000e+00> : vector<16x128xf32>
    %104 = tpu.matmul %102, %103, %cst_46 {dimension_numbers = #tpu.dot_dimension_numbers<[1], [0], [0], [1], [0, 0, 1, 1], [], []>} : vector<16x64xbf16>, vector<64x128xbf16>, vector<16x128xf32> -> vector<16x128xf32>
    %c0_47 = arith.constant 0 : index
    %c0_48 = arith.constant 0 : index
    %105 = vector.load %arg12[%c0_47, %c0_48] : memref<64x128xbf16, #tpu.memory_space<vmem>>, vector<64x128xbf16>
    %cst_49 = arith.constant dense<0.000000e+00> : vector<16x128xf32>
    %106 = tpu.matmul %102, %105, %cst_49 {dimension_numbers = #tpu.dot_dimension_numbers<[1], [0], [0], [1], [0, 0, 1, 1], [], []>} : vector<16x64xbf16>, vector<64x128xbf16>, vector<16x128xf32> -> vector<16x128xf32>
    %cst_50 = arith.constant 5.000000e-01 : f32
    %107 = vector.broadcast %cst_50 : f32 to vector<16x128xf32>
    %108 = arith.mulf %107, %104 : vector<16x128xf32>
    %cst_51 = arith.constant 4.471500e-02 : f32
    %109 = vector.broadcast %cst_51 : f32 to vector<16x128xf32>
    %110 = arith.mulf %109, %104 : vector<16x128xf32>
    %111 = arith.mulf %110, %104 : vector<16x128xf32>
    %112 = arith.mulf %111, %104 : vector<16x128xf32>
    %113 = arith.addf %104, %112 : vector<16x128xf32>
    %cst_52 = arith.constant 0.797884583 : f32
    %114 = vector.broadcast %cst_52 : f32 to vector<16x128xf32>
    %115 = arith.mulf %114, %113 : vector<16x128xf32>
    %116 = math.tanh %115 : vector<16x128xf32>
    %cst_53 = arith.constant 1.000000e+00 : f32
    %117 = vector.broadcast %cst_53 : f32 to vector<16x128xf32>
    %118 = arith.addf %117, %116 : vector<16x128xf32>
    %119 = arith.mulf %108, %118 : vector<16x128xf32>
    %120 = arith.mulf %119, %106 : vector<16x128xf32>
    %121 = arith.truncf %120 : vector<16x128xf32> to vector<16x128xbf16>
    %c0_54 = arith.constant 0 : index
    %c0_55 = arith.constant 0 : index
    %122 = vector.load %arg13[%c0_54, %c0_55] : memref<128x64xbf16, #tpu.memory_space<vmem>>, vector<128x64xbf16>
    %cst_56 = arith.constant dense<0.000000e+00> : vector<16x64xf32>
    %123 = tpu.matmul %121, %122, %cst_56 {dimension_numbers = #tpu.dot_dimension_numbers<[1], [0], [0], [1], [0, 0, 1, 1], [], []>} : vector<16x128xbf16>, vector<128x64xbf16>, vector<16x64xf32> -> vector<16x64xf32>
    %124 = arith.addf %86, %123 : vector<16x64xf32>
    %c0_57 = arith.constant 0 : index
    %c0_58 = arith.constant 0 : index
    %125 = vector.load %arg14[%c0_57, %c0_58] : memref<16x64xf32, #tpu.memory_space<vmem>>, vector<16x64xf32>
    tpu.vector_store %arg14[%c0_57, %c0_58], %124 {strides = array<i32>} : memref<16x64xf32, #tpu.memory_space<vmem>>, vector<16x64xf32>,
    return
  }
}

</mosaic_0001>

<bundles_post_ra>
// kernel: tpu_custom_call.1
= control target key start
LH: loop header
LB: loop body
LE: loop exit
PB: predicated region body
PF: predicated region fallthrough
CT: control target
= control target key end

     0   :  { %vm64_vm0 = vcmask 523264   ;;  %v2935_v8 = vmov 0.0   ;;  %vm2936_vm1 = vmmov 0   ;;  %s3532_s0 = inlined_call_operand.vmem [shape: f32[16,64], index: 0, kind: input, shape index: {}]   ;;  %s3533_s1 = inlined_call_operand.vmem [shape: f32[16,32], index: 1, kind: input, shape index: {}]   ;;  %s3534_s2 = inlined_call_operand.vmem [shape: f32[16,32], index: 2, kind: input, shape index: {}]   ;;  %s3535_s3 = inlined_call_operand.vmem [shape: f32[16,16], index: 3, kind: input, shape index: {}]   ;;  %s3536_s4 = inlined_call_operand.vmem [shape: f32[32,32], index: 4, kind: input, shape index: {}]   ;;  %s3537_s5 = inlined_call_operand.vmem [shape: f32[1,64], index: 5, kind: input, shape index: {}]   ;;  %s3538_s6 = inlined_call_operand.vmem [shape: f32[1,64], index: 6, kind: input, shape index: {}]   ;;  %s3539_s7 = inlined_call_operand.vmem [shape: bf16[4,64,32], index: 7, kind: input, shape index: {}]   ;;  %s3540_s8 = inlined_call_operand.vmem [shape: bf16[2,64,32], index: 8, kind: input, shape index: {}]   ;;  %s3541_s9 = inlined_call_operand.vmem [shape: bf16[2,64,32], index: 9, kind: input, shape index: {}]   ;;  %s3542_s10 = inlined_call_operand.vmem [shape: bf16[4,32,64], index: 10, kind: input, shape index: {}]   ;;  %s3543_s11 = inlined_call_operand.vmem [shape: bf16[64,128], index: 11, kind: input, shape index: {}]   ;;  %s3544_s12 = inlined_call_operand.vmem [shape: bf16[64,128], index: 12, kind: input, shape index: {}]   ;;  %s3545_s13 = inlined_call_operand.vmem [shape: bf16[128,64], index: 13, kind: input, shape index: {}]   ;;  %s3546_s14 = inlined_call_operand.hbm [shape: f32[16,64], index: 14, kind: output, shape index: {}]  }
   0x1   :  { %v49_v0 = vld [vmem:[%s3532_s0] sm:$0xff]  ;;  %v50_v1 = vld [vmem:[%s3532_s0 + $0x8] sm:$0xff]  ;;  %2470 = vmatprep.subr.bf16.mxu1 %v2935_v8  ;;  %2494 = vmatprep.subr.bf16.mxu0 %v2935_v8  ;;  %v2813_v11 = vld [vmem:[%s3539_s7 + $0x10] sm:$0xff]  }
   0x2   :  { %v62_v2 = vmul.f32 %v49_v0, %v49_v0  ;;  %v63_v3 = vmul.f32 %v50_v1, %v50_v1  ;;  %v2809_v6 = vld [vmem:[%s3539_s7] sm:$0xff]   ;;  %v2811_v9 = vld [vmem:[%s3539_s7 + $0x8] sm:$0xff]   ;;  %v2814_v12 = vld [vmem:[%s3539_s7 + $0x50] sm:$0xff]   ;;  %2478 = vmatprep.mubr.msk.bf16.mxu1 %vm2936_vm1, %v2935_v8  ;;  %2502 = vmatprep.mubr.msk.bf16.mxu0 %vm2936_vm1, %v2935_v8 }
   0x3   :  { %v2810_v7 = vld [vmem:[%s3539_s7 + $0x40] sm:$0xff]   ;;  %2471 = vmatpush3.bf16.msra.mxu1 %v2809_v6  ;;  %v2812_v10 = vld [vmem:[%s3539_s7 + $0x48] sm:$0xff]   ;;  %v2815_v13 = vld [vmem:[%s3539_s7 + $0x18] sm:$0xff]  }
   0x4   :  { %v65_v4 = vsel %vm64_vm0, %v62_v2, 0.0  ;;  %v68_v5 = vsel %vm64_vm0, %v63_v3, 0.0  ;;  %2495 = vmatpush3.bf16.msra.mxu0 %v2810_v7  ;;  %2472 = vmatprep.subr.bf16.mxu1 %v2935_v8  ;;  %v2816_v14 = vld [vmem:[%s3539_s7 + $0x58] sm:$0xff]  }
   0x5   :  { %66 = vadd.xlane.f32.xlu0 %v65_v4  ;;  %2496 = vmatprep.subr.bf16.mxu0 %v2935_v8 }
   0x7   :  { %2473 = vmatpush3.bf16.msra.mxu1 %v2811_v9 }
   0x8   :  { %2497 = vmatpush3.bf16.msra.mxu0 %v2812_v10  ;;  %2474 = vmatprep.subr.bf16.mxu1 %v2935_v8 }
   0x9   :  { %69 = vadd.xlane.f32.xlu0 %v68_v5  ;;  %2498 = vmatprep.subr.bf16.mxu0 %v2935_v8 }
   0xb   :  { %2475 = vmatpush3.bf16.msra.mxu1 %v2813_v11 }
   0xc   :  { %2499 = vmatpush3.bf16.msra.mxu0 %v2814_v12  ;;  %2476 = vmatprep.subr.bf16.mxu1 %v2935_v8 }
   0xd   :  { %2500 = vmatprep.subr.bf16.mxu0 %v2935_v8 }
   0xf   :  { %2477 = vmatpush3.bf16.msra.mxu1 %v2815_v13 }
  0x10   :  { %2501 = vmatpush3.bf16.msra.mxu0 %v2816_v14  ;;  %2482 = vmatprep.subr.bf16.mxu1 %v2935_v8 }
  0x11   :  { %2518 = vmatprep.subr.bf16.mxu0 %v2935_v8 }
  0x12   :  { %19 = vsyncpa [#allocation3], 0  ;;  %v82_v20 = vlaneseq  ;;  %v61_v23 = vld [vmem:[%s3537_s5] sm:$0x1]  ;;  %v2819_v36 = vld [vmem:[%s3539_s7 + $0x28] sm:$0xff]   ;;  %vm677_vm2 = vcmask 261120  }
  0x13   :  { %v80_v24 = vadd.f32 1.0, %v61_v23  ;;  %v2817_v33 = vld [vmem:[%s3539_s7 + $0x20] sm:$0xff]   ;;  %v2820_v37 = vld [vmem:[%s3540_s8 + $0x8] sm:$0xff]   ;;  %v2821_v38 = vld [vmem:[%s3539_s7 + $0x30] sm:$0xff]   ;;  %vm1404_vm3 = vcmask 130048  }
  0x14   :  { %v3061_v22 = vshrl.u32 %v82_v20, 7  ;;  %v2818_v34 = vld [vmem:[%s3540_s8] sm:$0xff]   ;;  %v2822_v39 = vld [vmem:[%s3540_s8 + $0x10] sm:$0xff]   ;;  %v2823_v40 = vld [vmem:[%s3539_s7 + $0x38] sm:$0xff]  }
  0x15   :  { %v2824_v41 = vld [vmem:[%s3540_s8 + $0x18] sm:$0xff]   ;;  %v2825_v42 = vld [vmem:[%s3539_s7 + $0x60] sm:$0xff]   ;;  %v2827_v44 = vld [vmem:[%s3539_s7 + $0x68] sm:$0xff]  }
  0x16   :  { %v84_v25 = vsub.s32 0, %v3061_v22  ;;  %v2826_v43 = vld [vmem:[%s3541_s9] sm:$0xff]   ;;  %v2828_v45 = vld [vmem:[%s3541_s9 + $0x8] sm:$0xff]   ;;  %v2829_v46 = vld [vmem:[%s3539_s7 + $0x70] sm:$0xff]  }
  0x17   :  { %v2830_v47 = vld [vmem:[%s3541_s9 + $0x10] sm:$0xff]   ;;  %v57_v48 = vld [vmem:[%s3536_s4] sm:$0xff]  ;;  %v58_v49 = vld [vmem:[%s3536_s4 + $0x8] sm:$0xff] }
  0x18   :  { %v85_v27 = vrot.slane %v80_v24, %v84_v25  ;;  %v2831_v50 = vld [vmem:[%s3539_s7 + $0x78] sm:$0xff]   ;;  %v3155_v52 = vpack.c.bf16 %v58_v49, %v57_v48  ;;  %v59_v53 = vld [vmem:[%s3536_s4 + $0x10] sm:$0xff]  ;;  %v2833_v55 = vld [vmem:[%s3540_s8 + $0x20] sm:$0xff]  }
  0x19   :  { %v2832_v51 = vld [vmem:[%s3541_s9 + $0x18] sm:$0xff]   ;;  %v2834_v57 = vld [vmem:[%s3540_s8 + $0x28] sm:$0xff]   ;;  %v2835_v58 = vld [vmem:[%s3540_s8 + $0x30] sm:$0xff]  }
  0x1a   :  { %v60_v54 = vld [vmem:[%s3536_s4 + $0x18] sm:$0xff]  ;;  %v2837_v60 = vld [vmem:[%s3541_s9 + $0x20] sm:$0xff]   ;;  %v2838_v61 = vld [vmem:[%s3541_s9 + $0x28] sm:$0xff]  }
  0x1b   :  { %v3168_v56 = vpack.c.bf16 %v60_v54, %v59_v53  ;;  %v2836_v59 = vld [vmem:[%s3540_s8 + $0x38] sm:$0xff]   ;;  %v2839_v62 = vld [vmem:[%s3541_s9 + $0x30] sm:$0xff]   ;;  %v2857_v22 = vld [vmem:[%s3545_s13] sm:$0xff]  }
  0x1c   :  { %v2840_v63 = vld [vmem:[%s3541_s9 + $0x38] sm:$0xff]  }
  0x92   :  { %v67_v15 = vpop.xlane.xlu0 %66 }
  0x93   :  { %v72_v16 = vmul.f32 0.015625, %v67_v15 }
  0x95   :  { %v74_v17 = vadd.f32 1e-06, %v72_v16 }
  0x96   :  { %v70_v18 = vpop.xlane.xlu0 %69 }
  0x97   :  { %2865 = vrsqrt.f32 %v74_v17  ;;  %v73_v19 = vmul.f32 0.015625, %v70_v18 }
  0x99   :  { %v75_v21 = vadd.f32 1e-06, %v73_v19 }
  0x9b   :  { %2867 = vrsqrt.f32 %v75_v21 }
  0xa1   :  { %v2866_v26 = vpop.eup %2865 }
  0xa2   :  { %v78_v28 = vmul.f32 %v2866_v26, %v49_v0 }
  0xa4   :  { %v87_v31 = vmul.f32 %v85_v27, %v78_v28 }
  0xa5   :  { %v2868_v29 = vpop.eup %2867 }
  0xa6   :  { %v79_v30 = vmul.f32 %v2868_v29, %v50_v1 }
  0xa8   :  { %v88_v32 = vmul.f32 %v85_v27, %v79_v30 }
  0xaa   :  { %v3075_v35 = vpack.c.bf16 %v88_v32, %v87_v31 }
  0xac   :  { %2479 = vmatmul.mubr.msk.bf16.vlgmr.msra.gmra.mrb[0].mxu1 %vm64_vm0, %v3075_v35  ;;  %2503 = vmatmul.mubr.msk.bf16.vlgmr.msra.gmra.mrb[0].mxu0 %vm64_vm0, %v3075_v35 }
  0xad   :  { %2483 = vmatpush3.bf16.msra.mxu1 %v2817_v33  ;;  %2519 = vmatpush3.bf16.msra.mxu0 %v2818_v34 }
  0xae   :  { %2484 = vmatprep.subr.bf16.mxu1 %v2935_v8  ;;  %2520 = vmatprep.subr.bf16.mxu0 %v2935_v8 }
  0xaf   :  { %2490 = vmatprep.mubr.msk.bf16.mxu1 %vm2936_vm1, %v2935_v8  ;;  %2526 = vmatprep.mubr.msk.bf16.mxu0 %vm2936_vm1, %v2935_v8 }
  0xb1   :  { %2485 = vmatpush3.bf16.msra.mxu1 %v2819_v36  ;;  %2521 = vmatpush3.bf16.msra.mxu0 %v2820_v37  ;;  %v52_v37 = vld [vmem:[%s3533_s1 + $0x8] sm:$0xff] }
  0xb2   :  { %2486 = vmatprep.subr.bf16.mxu1 %v2935_v8  ;;  %2522 = vmatprep.subr.bf16.mxu0 %v2935_v8 }
  0xb5   :  { %2487 = vmatpush3.bf16.msra.mxu1 %v2821_v38  ;;  %2523 = vmatpush3.bf16.msra.mxu0 %v2822_v39  ;;  %v54_v38 = vld [vmem:[%s3534_s2 + $0x8] sm:$0xff]  ;;  %v51_v39 = vld [vmem:[%s3533_s1] sm:$0xff] }
  0xb6   :  { %2488 = vmatprep.subr.bf16.mxu1 %v2935_v8  ;;  %2524 = vmatprep.subr.bf16.mxu0 %v2935_v8 }
  0xb9   :  { %2489 = vmatpush3.bf16.msra.mxu1 %v2823_v40  ;;  %2525 = vmatpush3.bf16.msra.mxu0 %v2824_v41  ;;  %v53_v40 = vld [vmem:[%s3534_s2] sm:$0xff] }
  0xba   :  { %2506 = vmatprep.subr.bf16.mxu1 %v2935_v8  ;;  %2542 = vmatprep.subr.bf16.mxu0 %v2935_v8 }
  0xbc   :  { %2491 = vmatmul.mubr.msk.bf16.vlgmr.msra.gmra.mrb[4].mxu1 %vm64_vm0, %v3075_v35  ;;  %2527 = vmatmul.mubr.msk.bf16.vlgmr.msra.gmra.mrb[4].mxu0 %vm64_vm0, %v3075_v35 }
  0xbd   :  { %2507 = vmatpush3.bf16.msra.mxu1 %v2825_v42  ;;  %2543 = vmatpush3.bf16.msra.mxu0 %v2826_v43 }
  0xbe   :  { %2508 = vmatprep.subr.bf16.mxu1 %v2935_v8  ;;  %2544 = vmatprep.subr.bf16.mxu0 %v2935_v8 }
  0xbf   :  { %2514 = vmatprep.mubr.msk.bf16.mxu1 %vm2936_vm1, %v2935_v8  ;;  %2550 = vmatprep.mubr.msk.bf16.mxu0 %vm2936_vm1, %v2935_v8 }
  0xc1   :  { %2509 = vmatpush3.bf16.msra.mxu1 %v2827_v44  ;;  %2545 = vmatpush3.bf16.msra.mxu0 %v2828_v45 }
  0xc2   :  { %2510 = vmatprep.subr.bf16.mxu1 %v2935_v8  ;;  %2546 = vmatprep.subr.bf16.mxu0 %v2935_v8 }
  0xc5   :  { %2511 = vmatpush3.bf16.msra.mxu1 %v2829_v46  ;;  %2547 = vmatpush3.bf16.msra.mxu0 %v2830_v47 }
  0xc6   :  { %2512 = vmatprep.subr.bf16.mxu1 %v2935_v8  ;;  %2548 = vmatprep.subr.bf16.mxu0 %v2935_v8 }
  0xc9   :  { %2513 = vmatpush3.bf16.msra.mxu1 %v2831_v50  ;;  %2549 = vmatpush3.bf16.msra.mxu0 %v2832_v51 }
  0xca   :  { %2530 = vmatprep.subr.bf16.mxu1 %v2935_v8  ;;  %2757 = vmatprep.subr.bf16.mxu0 %v3155_v52 }
  0xcc   :  { %2515 = vmatmul.mubr.msk.bf16.vlgmr.msra.gmra.mrb[8].mxu1 %vm64_vm0, %v3075_v35  ;;  %2551 = vmatmul.mubr.msk.bf16.vlgmr.msra.gmra.mrb[8].mxu0 %vm64_vm0, %v3075_v35 }
  0xcd   :  { %2531 = vmatpush3.bf16.msra.mxu1 %v2833_v55  ;;  %2538 = vmatprep.mubr.msk.bf16.mxu1 %vm2936_vm1, %v2935_v8 }
  0xce   :  { %2532 = vmatprep.subr.bf16.mxu1 %v2935_v8  ;;  %2759 = vmatpush3.bf16.msra.mxu0 %v3155_v52 }
  0xcf   :  { %2761 = vmatprep.subr.bf16.mxu0 %v3168_v56 }
  0xd1   :  { %2533 = vmatpush3.bf16.msra.mxu1 %v2834_v57 }
  0xd2   :  { %2534 = vmatprep.subr.bf16.mxu1 %v2935_v8  ;;  %2763 = vmatpush3.bf16.msra.mxu0 %v3168_v56 }
  0xd3   :  { %2773 = vmatprep.subr.bf16.mxu0 %v3155_v52 }
  0xd5   :  { %2535 = vmatpush3.bf16.msra.mxu1 %v2835_v58 }
  0xd6   :  { %2536 = vmatprep.subr.bf16.mxu1 %v2935_v8 }
  0xd9   :  { %2537 = vmatpush3.bf16.msra.mxu1 %v2836_v59 }
  0xda   :  { %2554 = vmatprep.subr.bf16.mxu1 %v2935_v8 }
  0xdc   :  { %2539 = vmatmul.mubr.msk.bf16.vlgmr.msra.gmra.mrb[12].mxu1 %vm64_vm0, %v3075_v35 }
  0xdd   :  { %2555 = vmatpush3.bf16.msra.mxu1 %v2837_v60  ;;  %2562 = vmatprep.mubr.msk.bf16.mxu1 %vm2936_vm1, %v2935_v8 }
  0xde   :  { %2556 = vmatprep.subr.bf16.mxu1 %v2935_v8 }
  0xe1   :  { %2557 = vmatpush3.bf16.msra.mxu1 %v2838_v61 }
  0xe2   :  { %2558 = vmatprep.subr.bf16.mxu1 %v2935_v8 }
  0xe5   :  { %2559 = vmatpush3.bf16.msra.mxu1 %v2839_v62 }
  0xe6   :  { %2560 = vmatprep.subr.bf16.mxu1 %v2935_v8 }
  0xe9   :  { %2561 = vmatpush3.bf16.msra.mxu1 %v2840_v63 }
  0xea   :  { %2765 = vmatprep.subr.bf16.mxu1 %v3155_v52 }
  0xec   :  { %2563 = vmatmul.mubr.msk.bf16.vlgmr.msra.gmra.mrb[16].mxu1 %vm64_vm0, %v3075_v35 }
  0xed   :  { %2767 = vmatpush3.bf16.msra.mxu1 %v3155_v52 }
  0xee   :  { %2769 = vmatprep.subr.bf16.mxu1 %v3168_v56 }
  0xf1   :  { %2771 = vmatpush3.bf16.msra.mxu1 %v3168_v56 }
  0xf2   :  { %2781 = vmatprep.subr.bf16.mxu1 %v3155_v52 }
 0x17f   :  { %v3219_v0 = vpop.f32.mrb[0].mxu1  ;;  %v3221_v1 = vpop.f32.mrb[0].mxu0 }
 0x180   :  { %v2480_v2 = vpop.f32.mrb[1].mxu1  ;;  %v2504_v3 = vpop.f32.mrb[1].mxu0  ;;  %2574 = vmatprep.mubr.msk.f32.mxu0 %vm677_vm2, %v3219_v0  ;;  %v1002_v45 = vmul.f32 %v3219_v0, %v51_v39  ;;  %v1006_v54 = vmul.f32 %v3221_v1, %v51_v39 }
 0x181   :  { %v3225_v4 = vpop.f32.mrb[2].mxu1  ;;  %v3227_v5 = vpop.f32.mrb[2].mxu0 }
 0x182   :  { %v2481_v6 = vpop.f32.mrb[3].mxu1  ;;  %v2505_v7 = vpop.f32.mrb[3].mxu0  ;;  %2575 = vmatmul.mubr.msk.f32.vlgmr.msra.gmra.mrb[12].mxu0 %vm677_vm2, %v3225_v4  ;;  %v1003_v42 = vmul.f32 %v3225_v4, %v52_v37  ;;  %v1007_v51 = vmul.f32 %v3227_v5, %v52_v37 }
 0x183   :  { %2775 = vmatpush3.bf16.msra.mxu0 %v3155_v52  ;;  %2596 = vmatprep.mubr.msk.f32.mxu0 %vm677_vm2, %v3221_v1 }
 0x184   :  { %2777 = vmatprep.subr.bf16.mxu0 %v3168_v56 }
 0x187   :  { %2779 = vmatpush3.bf16.msra.mxu0 %v3168_v56 }
 0x188   :  { %2789 = vmatprep.subr.bf16.mxu0 %v3155_v52 }
 0x18a   :  { %2597 = vmatmul.mubr.msk.f32.vlgmr.msra.gmra.mrb[14].mxu0 %vm677_vm2, %v3227_v5 }
 0x18b   :  { %2791 = vmatpush3.bf16.msra.mxu0 %v3155_v52 }
 0x18c   :  { %2793 = vmatprep.subr.bf16.mxu0 %v3168_v56 }
 0x18f   :  { %v3241_v9 = vpop.f32.mrb[4].mxu1  ;;  %v3243_v10 = vpop.f32.mrb[4].mxu0  ;;  %2795 = vmatpush3.bf16.msra.mxu0 %v3168_v56 }
 0x190   :  { %v2492_v11 = vpop.f32.mrb[5].mxu1  ;;  %v2528_v12 = vpop.f32.mrb[5].mxu0  ;;  %2585 = vmatprep.mubr.msk.f32.mxu1 %vm677_vm2, %v3241_v9  ;;  %2618 = vmatprep.mubr.msk.f32.mxu0 %vm677_vm2, %v3243_v10  ;;  %v1004_v4 = vmul.f32 %v3241_v9, %v51_v39  ;;  %v1188_v5 = vmul.f32 %v3243_v10, %v51_v39 }
 0x191   :  { %v3250_v13 = vpop.f32.mrb[6].mxu1  ;;  %v3252_v14 = vpop.f32.mrb[6].mxu0  ;;  %2632 = vmatprep.subr.bf16.mxu0 %v2935_v8 }
 0x192   :  { %v2493_v15 = vpop.f32.mrb[7].mxu1  ;;  %v2529_v16 = vpop.f32.mrb[7].mxu0  ;;  %2586 = vmatmul.mubr.msk.f32.vlgmr.msra.gmra.mrb[20].mxu1 %vm677_vm2, %v3250_v13  ;;  %2619 = vmatmul.mubr.msk.f32.vlgmr.msra.gmra.mrb[16].mxu0 %vm677_vm2, %v3252_v14  ;;  %v1005_v61 = vmul.f32 %v3250_v13, %v52_v37  ;;  %v1189_v62 = vmul.f32 %v3252_v14, %v52_v37 }
 0x193   :  { %2783 = vmatpush3.bf16.msra.mxu1 %v3155_v52  ;;  %2634 = vmatprep.mubr.msk.bf16.mxu0 %vm2936_vm1, %v2935_v8 }
 0x194   :  { %2785 = vmatprep.subr.bf16.mxu1 %v3168_v56 }
 0x197   :  { %2787 = vmatpush3.bf16.msra.mxu1 %v3168_v56 }
 0x198   :  { %2797 = vmatprep.subr.bf16.mxu1 %v3155_v52 }
 0x19f   :  { %v3265_v17 = vpop.f32.mrb[8].mxu1  ;;  %v605_v18 = vpop.f32.mrb[8].mxu0 }
 0x1a0   :  { %v2516_v19 = vpop.f32.mrb[9].mxu1  ;;  %v2552_v20 = vpop.f32.mrb[9].mxu0  ;;  %2607 = vmatprep.mubr.msk.f32.mxu1 %vm677_vm2, %v3265_v17 }
 0x1a1   :  { %v3269_v21 = vpop.f32.mrb[10].mxu1  ;;  %v608_v23 = vpop.f32.mrb[10].mxu0  ;;  %v1008_v20 = vmul.f32 %v3265_v17, %v51_v39 }
 0x1a2   :  { %v3271_v24 = vpack.c.bf16 %v608_v23, %v605_v18  ;;  %v2517_v26 = vpop.f32.mrb[11].mxu1  ;;  %v2553_v27 = vpop.f32.mrb[11].mxu0  ;;  %2608 = vmatmul.mubr.msk.f32.vlgmr.msra.gmra.mrb[22].mxu1 %vm677_vm2, %v3269_v21  ;;  %v1009_v9 = vmul.f32 %v3269_v21, %v52_v37 }
 0x1a3   :  { %2799 = vmatpush3.bf16.msra.mxu1 %v3155_v52 }
 0x1a4   :  { %2801 = vmatprep.subr.bf16.mxu1 %v3168_v56 }
 0x1a7   :  { %2803 = vmatpush3.bf16.msra.mxu1 %v3168_v56 }
 0x1a8   :  { %2638 = vmatprep.subr.bf16.mxu1 %v2935_v8 }
 0x1af   :  { %v3279_v28 = vpop.f32.mrb[12].mxu1 }
 0x1b0   :  { %v2540_v29 = vpop.f32.mrb[13].mxu1  ;;  %2629 = vmatprep.mubr.msk.f32.mxu1 %vm677_vm2, %v3279_v28  ;;  %v1190_v21 = vmul.f32 %v3279_v28, %v51_v39 }
 0x1b1   :  { %v3283_v30 = vpop.f32.mrb[14].mxu1 }
 0x1b2   :  { %v2541_v31 = vpop.f32.mrb[15].mxu1  ;;  %2630 = vmatmul.mubr.msk.f32.vlgmr.msra.gmra.mrb[24].mxu1 %vm677_vm2, %v3283_v30 }
 0x1b3   :  { %2640 = vmatprep.mubr.msk.bf16.mxu1 %vm2936_vm1, %v2935_v8 }
 0x1bf   :  { %v670_v32 = vpop.f32.mrb[16].mxu1 }
 0x1c0   :  { %v2564_v33 = vpop.f32.mrb[17].mxu1 }
 0x1c1   :  { %v673_v34 = vpop.f32.mrb[18].mxu1 }
 0x1c2   :  { %v3289_v35 = vpack.c.bf16 %v673_v34, %v670_v32  ;;  %v2565_v36 = vpop.f32.mrb[19].mxu1  ;;  %v1191_v32 = vmul.f32 %v3283_v30, %v52_v37  ;;  %v55_v30 = vld [vmem:[%s3535_s3] sm:$0xff] }
 0x255   :  { %v2576_v41 = vpop.f32.mrb[12].mxu0 }
 0x256   :  { %v1011_v43 = vmul.f32 %v2576_v41, %v54_v38  ;;  %v750_v44 = vpop.f32.mrb[13].mxu0 }
 0x257   :  { %v1010_v46 = vmul.f32 %v750_v44, %v53_v40 }
 0x258   :  { %v1019_v47 = vadd.f32 %v1011_v43, %v1003_v42 }
 0x259   :  { %v1018_v48 = vadd.f32 %v1010_v46, %v1002_v45  ;;  %v56_v46 = vld [vmem:[%s3535_s3 + $0x8] sm:$0xff] }
 0x25b   :  { %v1200_v49 = vpack.c.bf16 %v1019_v47, %v1018_v48 }
 0x25d   :  { %v2598_v50 = vpop.f32.mrb[14].mxu0 }
 0x25e   :  { %v1015_v52 = vmul.f32 %v2598_v50, %v54_v38  ;;  %v912_v53 = vpop.f32.mrb[15].mxu0 }
 0x25f   :  { %v1014_v55 = vmul.f32 %v912_v53, %v53_v40 }
 0x260   :  { %v1023_v56 = vadd.f32 %v1015_v52, %v1007_v51 }
 0x261   :  { %v1022_v57 = vadd.f32 %v1014_v55, %v1006_v54 }
 0x263   :  { %v1202_v58 = vpack.c.bf16 %v1023_v56, %v1022_v57 }
 0x265   :  { %v2587_v59 = vpop.f32.mrb[20].mxu1  ;;  %v2620_v60 = vpop.f32.mrb[16].mxu0 }
 0x266   :  { %v1013_v63 = vmul.f32 %v2587_v59, %v54_v38  ;;  %v1193_v0 = vmul.f32 %v2620_v60, %v54_v38  ;;  %v831_v2 = vpop.f32.mrb[21].mxu1  ;;  %v1098_v3 = vpop.f32.mrb[17].mxu0 }
 0x267   :  { %v1012_v6 = vmul.f32 %v831_v2, %v53_v40  ;;  %v1192_v1 = vmul.f32 %v1098_v3, %v53_v40 }
 0x268   :  { %v1021_v7 = vadd.f32 %v1013_v63, %v1005_v61  ;;  %v1197_v11 = vadd.f32 %v1193_v0, %v1189_v62 }
 0x269   :  { %v1020_v12 = vadd.f32 %v1012_v6, %v1004_v4  ;;  %v1196_v15 = vadd.f32 %v1192_v1, %v1188_v5 }
 0x26b   :  { %v1201_v16 = vpack.c.bf16 %v1021_v7, %v1020_v12  ;;  %v1204_v18 = vpack.c.bf16 %v1197_v11, %v1196_v15 }
 0x26d   :  { %v1210_v13 = vsel %vm677_vm2, %v1204_v18, 0 }
 0x26e   :  { %2633 = vmatpush3.bf16.xpose.msra.mxu0 %v1210_v13  ;;  %2639 = vmatpush3.bf16.xpose.msra.mxu1 %v1210_v13 }
 0x26f   :  { %2644 = vmatprep.subr.bf16.mxu0 %v2935_v8  ;;  %2650 = vmatprep.subr.bf16.mxu1 %v2935_v8 }
 0x275   :  { %v2609_v14 = vpop.f32.mrb[22].mxu1  ;;  %2635 = vmatmul.mubr.msk.bf16.vlgmr.msra.gmra.mrb[20].mxu0 %vm677_vm2, %v1200_v49  ;;  %2641 = vmatmul.mubr.msk.bf16.vlgmr.msra.gmra.mrb[28].mxu1 %vm677_vm2, %v1201_v16 }
 0x276   :  { %v1017_v10 = vmul.f32 %v2609_v14, %v54_v38  ;;  %v993_v19 = vpop.f32.mrb[23].mxu1  ;;  %2646 = vmatprep.mubr.msk.bf16.mxu0 %vm2936_vm1, %v2935_v8  ;;  %2652 = vmatprep.mubr.msk.bf16.mxu1 %vm2936_vm1, %v2935_v8 }
 0x277   :  { %v1016_v23 = vmul.f32 %v993_v19, %v53_v40 }
 0x278   :  { %v1025_v26 = vadd.f32 %v1017_v10, %v1009_v9 }
 0x279   :  { %v1024_v27 = vadd.f32 %v1016_v23, %v1008_v20 }
 0x27b   :  { %v1203_v29 = vpack.c.bf16 %v1025_v26, %v1024_v27 }
 0x285   :  { %v2631_v31 = vpop.f32.mrb[24].mxu1 }
 0x286   :  { %v1195_v33 = vmul.f32 %v2631_v31, %v54_v38  ;;  %v1179_v34 = vpop.f32.mrb[25].mxu1 }
 0x287   :  { %v1194_v36 = vmul.f32 %v1179_v34, %v53_v40 }
 0x288   :  { %v1199_v41 = vadd.f32 %v1195_v33, %v1191_v32 }
 0x289   :  { %v1198_v42 = vadd.f32 %v1194_v36, %v1190_v21 }
 0x28b   :  { %v1205_v43 = vpack.c.bf16 %v1199_v41, %v1198_v42 }
 0x28d   :  { %v1301_v44 = vsel %vm677_vm2, %v1205_v43, 0 }
 0x28e   :  { %2645 = vmatpush3.bf16.xpose.msra.mxu0 %v1301_v44  ;;  %2651 = vmatpush3.bf16.xpose.msra.mxu1 %v1301_v44 }
 0x28f   :  { %2656 = vmatprep.subr.bf16.mxu0 %v2935_v8  ;;  %2662 = vmatprep.subr.bf16.mxu1 %v2935_v8 }
 0x295   :  { %2647 = vmatmul.mubr.msk.bf16.vlgmr.msra.gmra.mrb[24].mxu0 %vm677_vm2, %v1202_v58  ;;  %2653 = vmatmul.mubr.msk.bf16.vlgmr.msra.gmra.mrb[32].mxu1 %vm677_vm2, %v1203_v29 }
 0x296   :  { %2657 = vmatpush3.bf16.msra.mxu0 %v3271_v24  ;;  %2663 = vmatpush3.bf16.msra.mxu1 %v3271_v24 }
 0x297   :  { %2658 = vmatprep.mubr.msk.bf16.mxu0 %vm2936_vm1, %v2935_v8  ;;  %2668 = vmatprep.subr.bf16.mxu0 %v2935_v8 }
 0x298   :  { %2664 = vmatprep.mubr.msk.bf16.mxu1 %vm2936_vm1, %v2935_v8  ;;  %2674 = vmatprep.subr.bf16.mxu1 %v2935_v8 }
 0x348   :  { %v1246_v17 = vpop.f32.mrb[20].mxu0  ;;  %v1290_v28 = vpop.f32.mrb[28].mxu1 }
 0x349   :  { %v1388_v37 = vmul.f32 0.17677669, %v1246_v17  ;;  %v1390_v38 = vmul.f32 0.17677669, %v1290_v28  ;;  %v2636_v39 = vpop.f32.mrb[21].mxu0  ;;  %v2642_v24 = vpop.f32.mrb[29].mxu1 }
 0x34a   :  { %v1249_v40 = vpop.f32.mrb[22].mxu0  ;;  %v1293_v45 = vpop.f32.mrb[30].mxu1 }
 0x34b   :  { %v1389_v47 = vmul.f32 0.17677669, %v1249_v40  ;;  %v2637_v48 = vpop.f32.mrb[23].mxu0  ;;  %v2643_v49 = vpop.f32.mrb[31].mxu1  ;;  %v1396_v50 = vadd.f32 %v1388_v37, %v55_v30  ;;  %v1398_v51 = vadd.f32 %v1390_v38, %v55_v30  ;;  %v1391_v52 = vmul.f32 0.17677669, %v1293_v45 }
 0x34d   :  { %v1405_v53 = vsel %vm1404_vm3, %v1396_v50, -inf  ;;  %v1411_v54 = vsel %vm1404_vm3, %v1398_v51, -inf  ;;  %v1397_v55 = vadd.f32 %v1389_v47, %v56_v46  ;;  %v1399_v57 = vadd.f32 %v1391_v52, %v56_v46 }
 0x34e   :  { %1406 = vmax.xlane.f32.xlu1 %v1405_v53  ;;  %1412 = vmax.xlane.f32.xlu0 %v1411_v54 }
 0x34f   :  { %v1408_v56 = vsel %vm1404_vm3, %v1397_v55, -inf  ;;  %v1414_v58 = vsel %vm1404_vm3, %v1399_v57, -inf }
 0x352   :  { %1409 = vmax.xlane.f32.xlu1 %v1408_v56 }
 0x356   :  { %1415 = vmax.xlane.f32.xlu1 %v1414_v58 }
 0x368   :  { %v1337_v59 = vpop.f32.mrb[24].mxu0  ;;  %v1381_v60 = vpop.f32.mrb[32].mxu1 }
 0x369   :  { %v1392_v61 = vmul.f32 0.17677669, %v1337_v59  ;;  %v1394_v62 = vmul.f32 0.17677669, %v1381_v60  ;;  %v2648_v63 = vpop.f32.mrb[25].mxu0  ;;  %v2654_v0 = vpop.f32.mrb[33].mxu1 }
 0x36a   :  { %v1340_v2 = vpop.f32.mrb[26].mxu0  ;;  %v1384_v3 = vpop.f32.mrb[34].mxu1 }
 0x36b   :  { %v1393_v4 = vmul.f32 0.17677669, %v1340_v2  ;;  %v1395_v5 = vmul.f32 0.17677669, %v1384_v3  ;;  %v2649_v6 = vpop.f32.mrb[27].mxu0  ;;  %v2655_v1 = vpop.f32.mrb[35].mxu1  ;;  %v1400_v7 = vadd.f32 %v1392_v61, %v55_v30  ;;  %v1402_v15 = vadd.f32 %v1394_v62, %v55_v30 }
 0x36d   :  { %v1417_v11 = vsel %vm1404_vm3, %v1400_v7, -inf  ;;  %v1401_v12 = vadd.f32 %v1393_v4, %v56_v46  ;;  %v1403_v18 = vadd.f32 %v1395_v5, %v56_v46  ;;  %v1423_v13 = vsel %vm1404_vm3, %v1402_v15, -inf }
 0x36e   :  { %1418 = vmax.xlane.f32.xlu0 %v1417_v11 }
 0x36f   :  { %v1420_v16 = vsel %vm1404_vm3, %v1401_v12, -inf  ;;  %v1426_v14 = vsel %vm1404_vm3, %v1403_v18, -inf }
 0x370   :  { %1421 = vmax.xlane.f32.xlu1 %v1420_v16 }
 0x372   :  { %1424 = vmax.xlane.f32.xlu0 %v1423_v13 }
 0x374   :  { %1427 = vmax.xlane.f32.xlu1 %v1426_v14 }
 0x3db   :  { %v1407_v9 = vpop.xlane.xlu1 %1406  ;;  %v1413_v10 = vpop.xlane.xlu0 %1412 }
 0x3dc   :  { %v1429_v19 = vsub.f32 %v1396_v50, %v1407_v9  ;;  %v1431_v20 = vsub.f32 %v1398_v51, %v1413_v10 }
 0x3de   :  { %v1437_v23 = vmul.f32 1.442695, %v1429_v19  ;;  %v1441_v26 = vmul.f32 1.442695, %v1431_v20 }
 0x3df   :  { %v1410_v27 = vpop.xlane.xlu1 %1409 }
 0x3e0   :  { %2869 = vpow2.f32 %v1437_v23  ;;  %v1430_v29 = vsub.f32 %v1397_v55, %v1410_v27 }
 0x3e1   :  { %2871 = vpow2.f32 %v1441_v26 }
 0x3e2   :  { %v1439_v31 = vmul.f32 1.442695, %v1430_v29 }
 0x3e3   :  { %v1416_v32 = vpop.xlane.xlu1 %1415 }
 0x3e4   :  { %2873 = vpow2.f32 %v1439_v31  ;;  %v1432_v33 = vsub.f32 %v1399_v57, %v1416_v32  ;;  %v2842_v31 = vld [vmem:[%s3542_s10 + $0x8] sm:$0xff]   ;;  %v2843_v32 = vld [vmem:[%s3542_s10 + $0x10] sm:$0xff]  }
 0x3e6   :  { %v1443_v34 = vmul.f32 1.442695, %v1432_v33  ;;  %v2844_v33 = vld [vmem:[%s3542_s10 + $0x18] sm:$0xff]  }
 0x3e8   :  { %2875 = vpow2.f32 %v1443_v34 }
 0x3ea   :  { %v2870_v21 = vpop.eup %2869 }
 0x3eb   :  { %v1453_v36 = vsel %vm1404_vm3, %v2870_v21, 0.0  ;;  %v2872_v41 = vpop.eup %2871 }
 0x3ec   :  { %1454 = vadd.xlane.f32.xlu0 %v1453_v36  ;;  %v1459_v43 = vsel %vm1404_vm3, %v2872_v41, 0.0 }
 0x3ee   :  { %v2874_v42 = vpop.eup %2873 }
 0x3ef   :  { %v1456_v44 = vsel %vm1404_vm3, %v2874_v42, 0.0 }
 0x3f0   :  { %1460 = vadd.xlane.f32.xlu0 %v1459_v43  ;;  %1457 = vadd.xlane.f32.xlu1 %v1456_v44 }
 0x3f2   :  { %v2876_v17 = vpop.eup %2875 }
 0x3f3   :  { %v1462_v28 = vsel %vm1404_vm3, %v2876_v17, 0.0 }
 0x3f4   :  { %1463 = vadd.xlane.f32.xlu1 %v1462_v28 }
 0x3fb   :  { %v1419_v30 = vpop.xlane.xlu0 %1418 }
 0x3fc   :  { %v1433_v37 = vsub.f32 %v1400_v7, %v1419_v30  ;;  %v2847_v30 = vld [vmem:[%s3542_s10 + $0x30] sm:$0xff]  }
 0x3fd   :  { %v1422_v38 = vpop.xlane.xlu1 %1421 }
 0x3fe   :  { %v1445_v39 = vmul.f32 1.442695, %v1433_v37  ;;  %v1434_v24 = vsub.f32 %v1401_v12, %v1422_v38 }
 0x3ff   :  { %v1425_v40 = vpop.xlane.xlu0 %1424 }
 0x400   :  { %2877 = vpow2.f32 %v1445_v39  ;;  %v1447_v45 = vmul.f32 1.442695, %v1434_v24  ;;  %v1435_v46 = vsub.f32 %v1402_v15, %v1425_v40  ;;  %v2846_v39 = vld [vmem:[%s3542_s10 + $0x28] sm:$0xff]   ;;  %v2848_v24 = vld [vmem:[%s3542_s10 + $0x38] sm:$0xff]  }
 0x401   :  { %v1428_v47 = vpop.xlane.xlu1 %1427 }
 0x402   :  { %2879 = vpow2.f32 %v1447_v45  ;;  %v1449_v48 = vmul.f32 1.442695, %v1435_v46  ;;  %v1436_v49 = vsub.f32 %v1403_v18, %v1428_v47 }
 0x404   :  { %2881 = vpow2.f32 %v1449_v48  ;;  %v1451_v50 = vmul.f32 1.442695, %v1436_v49 }
 0x406   :  { %2883 = vpow2.f32 %v1451_v50 }
 0x40a   :  { %v2878_v51 = vpop.eup %2877 }
 0x40b   :  { %v1465_v52 = vsel %vm1404_vm3, %v2878_v51, 0.0 }
 0x40c   :  { %v2880_v53 = vpop.eup %2879  ;;  %1466 = vadd.xlane.f32.xlu0 %v1465_v52 }
 0x40d   :  { %v1468_v54 = vsel %vm1404_vm3, %v2880_v53, 0.0 }
 0x40e   :  { %v2882_v55 = vpop.eup %2881  ;;  %1469 = vadd.xlane.f32.xlu1 %v1468_v54 }
 0x40f   :  { %v1471_v56 = vsel %vm1404_vm3, %v2882_v55, 0.0 }
 0x410   :  { %v2884_v57 = vpop.eup %2883  ;;  %1472 = vadd.xlane.f32.xlu0 %v1471_v56 }
 0x411   :  { %v1474_v58 = vsel %vm1404_vm3, %v2884_v57, 0.0 }
 0x412   :  { %1475 = vadd.xlane.f32.xlu1 %v1474_v58 }
 0x479   :  { %v1455_v59 = vpop.xlane.xlu0 %1454 }
 0x47a   :  { %2885 = vrcp.f32 %v1455_v59 }
 0x47d   :  { %v1461_v60 = vpop.xlane.xlu0 %1460  ;;  %v1458_v61 = vpop.xlane.xlu1 %1457 }
 0x47e   :  { %2887 = vrcp.f32 %v1458_v61 }
 0x47f   :  { %2889 = vrcp.f32 %v1461_v60 }
 0x481   :  { %v1464_v62 = vpop.xlane.xlu1 %1463 }
 0x482   :  { %2891 = vrcp.f32 %v1464_v62 }
 0x484   :  { %v2886_v63 = vpop.eup %2885 }
 0x485   :  { %v1485_v3 = vmul.f32 %v2886_v63, %v2870_v21 }
 0x488   :  { %v2888_v0 = vpop.eup %2887 }
 0x489   :  { %v2890_v2 = vpop.eup %2889  ;;  %v1486_v4 = vmul.f32 %v2888_v0, %v2874_v42 }
 0x48a   :  { %v1487_v1 = vmul.f32 %v2890_v2, %v2872_v41  ;;  %v2845_v41 = vld [vmem:[%s3542_s10 + $0x20] sm:$0xff]  }
 0x48b   :  { %v1493_v6 = vpack.c.bf16 %v1486_v4, %v1485_v3 }
 0x48c   :  { %v2892_v5 = vpop.eup %2891 }
 0x48d   :  { %v1488_v7 = vmul.f32 %v2892_v5, %v2876_v17  ;;  %2659 = vmatmul.mubr.msk.bf16.vlgmr.msra.gmra.mrb[28].mxu0 %vm1404_vm3, %v1493_v6 }
 0x48e   :  { %2669 = vmatpush3.bf16.msra.mxu0 %v3289_v35  ;;  %2670 = vmatprep.mubr.msk.bf16.mxu0 %vm2936_vm1, %v2935_v8 }
 0x48f   :  { %v1494_v11 = vpack.c.bf16 %v1488_v7, %v1487_v1  ;;  %2680 = vmatprep.subr.bf16.mxu0 %v2935_v8 }
 0x491   :  { %2665 = vmatmul.mubr.msk.bf16.vlgmr.msra.gmra.mrb[36].mxu1 %vm1404_vm3, %v1494_v11 }
 0x492   :  { %2675 = vmatpush3.bf16.msra.mxu1 %v3289_v35  ;;  %2676 = vmatprep.mubr.msk.bf16.mxu1 %vm2936_vm1, %v2935_v8  ;;  %v2841_v35 = vld [vmem:[%s3542_s10] sm:$0xff]  }
 0x493   :  { %2688 = vmatprep.subr.bf16.mxu1 %v2935_v8 }
 0x499   :  { %v1467_v12 = vpop.xlane.xlu0 %1466 }
 0x49a   :  { %2893 = vrcp.f32 %v1467_v12 }
 0x49b   :  { %v1470_v15 = vpop.xlane.xlu1 %1469 }
 0x49c   :  { %2895 = vrcp.f32 %v1470_v15 }
 0x49d   :  { %v1473_v16 = vpop.xlane.xlu0 %1472 }
 0x49e   :  { %2897 = vrcp.f32 %v1473_v16 }
 0x49f   :  { %v1476_v18 = vpop.xlane.xlu1 %1475 }
 0x4a0   :  { %2899 = vrcp.f32 %v1476_v18 }
 0x4a4   :  { %v2894_v13 = vpop.eup %2893 }
 0x4a5   :  { %v1489_v9 = vmul.f32 %v2894_v13, %v2878_v51 }
 0x4a6   :  { %v2896_v14 = vpop.eup %2895 }
 0x4a7   :  { %v1490_v10 = vmul.f32 %v2896_v14, %v2880_v53 }
 0x4a8   :  { %v2898_v19 = vpop.eup %2897 }
 0x4a9   :  { %v1495_v20 = vpack.c.bf16 %v1490_v10, %v1489_v9  ;;  %v1491_v26 = vmul.f32 %v2898_v19, %v2882_v55 }
 0x4aa   :  { %v2900_v23 = vpop.eup %2899 }
 0x4ab   :  { %v1492_v27 = vmul.f32 %v2900_v23, %v2884_v57  ;;  %2671 = vmatmul.mubr.msk.bf16.vlgmr.msra.gmra.mrb[32].mxu0 %vm1404_vm3, %v1495_v20  ;;  %v2909_v20 = vld [vmem:[%s3532_s0] sm:$0xff] }
 0x4ac   :  { %2681 = vmatpush3.bf16.msra.mxu0 %v2841_v35  ;;  %2684 = vmatprep.mubr.msk.bf16.mxu0 %vm2936_vm1, %v2935_v8 }
 0x4ad   :  { %v1496_v29 = vpack.c.bf16 %v1492_v27, %v1491_v26  ;;  %2682 = vmatprep.subr.bf16.mxu0 %v2935_v8  ;;  %v2910_v27 = vld [vmem:[%s3532_s0 + $0x8] sm:$0xff] }
 0x4af   :  { %2677 = vmatmul.mubr.msk.bf16.vlgmr.msra.gmra.mrb[40].mxu1 %vm1404_vm3, %v1496_v29 }
 0x4b0   :  { %2692 = vmatprep.mubr.msk.bf16.mxu1 %vm2936_vm1, %v2935_v8  ;;  %2683 = vmatpush3.bf16.msra.mxu0 %v2842_v31 }
 0x4b1   :  { %2689 = vmatpush3.bf16.msra.mxu1 %v2843_v32  ;;  %2696 = vmatprep.subr.bf16.mxu0 %v2935_v8 }
 0x4b2   :  { %2690 = vmatprep.subr.bf16.mxu1 %v2935_v8 }
 0x4b5   :  { %2691 = vmatpush3.bf16.msra.mxu1 %v2844_v33 }
 0x4b6   :  { %2704 = vmatprep.subr.bf16.mxu1 %v2935_v8 }
 0x560   :  { %v1536_v34 = vpop.f32.mrb[28].mxu0 }
 0x561   :  { %v2660_v21 = vpop.f32.mrb[29].mxu0 }
 0x562   :  { %v1539_v36 = vpop.f32.mrb[30].mxu0  ;;  %v2849_v21 = vld [vmem:[%s3543_s11] sm:$0xff]  }
 0x563   :  { %v1675_v42 = vpack.c.bf16 %v1539_v36, %v1536_v34  ;;  %v2661_v43 = vpop.f32.mrb[31].mxu0  ;;  %v2850_v36 = vld [vmem:[%s3544_s12] sm:$0xff]  }
 0x564   :  { %v1580_v44 = vpop.f32.mrb[36].mxu1  ;;  %v2853_v43 = vld [vmem:[%s3543_s11 + $0x10] sm:$0xff]  }
 0x565   :  { %v2666_v17 = vpop.f32.mrb[37].mxu1  ;;  %2685 = vmatmul.mubr.msk.bf16.vlgmr.msra.gmra.mrb[36].mxu0 %vm677_vm2, %v1675_v42  ;;  %v2852_v42 = vld [vmem:[%s3544_s12 + $0x8] sm:$0xff]  }
 0x566   :  { %v1583_v28 = vpop.f32.mrb[38].mxu1  ;;  %2697 = vmatpush3.bf16.msra.mxu0 %v2845_v41  ;;  %2700 = vmatprep.mubr.msk.bf16.mxu0 %vm2936_vm1, %v2935_v8  ;;  %v2851_v41 = vld [vmem:[%s3543_s11 + $0x8] sm:$0xff]   ;;  %v2855_v17 = vld [vmem:[%s3543_s11 + $0x18] sm:$0xff]  }
 0x567   :  { %v1676_v37 = vpack.c.bf16 %v1583_v28, %v1580_v44  ;;  %v2667_v38 = vpop.f32.mrb[39].mxu1  ;;  %2698 = vmatprep.subr.bf16.mxu0 %v2935_v8  ;;  %v2854_v44 = vld [vmem:[%s3544_s12 + $0x10] sm:$0xff]   ;;  %v2856_v28 = vld [vmem:[%s3544_s12 + $0x18] sm:$0xff]  }
 0x569   :  { %2693 = vmatmul.mubr.msk.bf16.vlgmr.msra.gmra.mrb[44].mxu1 %vm677_vm2, %v1676_v37 }
 0x56a   :  { %2705 = vmatpush3.bf16.msra.mxu1 %v2847_v30  ;;  %2708 = vmatprep.mubr.msk.bf16.mxu1 %vm2936_vm1, %v2935_v8 }
 0x56b   :  { %2699 = vmatpush3.bf16.msra.mxu0 %v2846_v39  ;;  %2706 = vmatprep.subr.bf16.mxu1 %v2935_v8 }
 0x56c   :  { %2712 = vmatprep.subr.bf16.mxu0 %v2935_v8 }
 0x56e   :  { %2707 = vmatpush3.bf16.msra.mxu1 %v2848_v24 }
 0x56f   :  { %2724 = vmatprep.subr.bf16.mxu1 %v2935_v8 }
 0x57e   :  { %v1624_v40 = vpop.f32.mrb[32].mxu0 }
 0x57f   :  { %v2672_v45 = vpop.f32.mrb[33].mxu0 }
 0x580   :  { %v1627_v46 = vpop.f32.mrb[34].mxu0  ;;  %v1935_v45 = vld [vmem:[%s3538_s6] sm:$0x1] }
 0x581   :  { %v1677_v47 = vpack.c.bf16 %v1627_v46, %v1624_v40  ;;  %v2673_v48 = vpop.f32.mrb[35].mxu0  ;;  %v1952_v46 = vadd.f32 1.0, %v1935_v45 }
 0x582   :  { %v1668_v49 = vpop.f32.mrb[40].mxu1 }
 0x583   :  { %v2678_v50 = vpop.f32.mrb[41].mxu1  ;;  %2701 = vmatmul.mubr.msk.bf16.vlgmr.msra.gmra.mrb[40].mxu0 %vm677_vm2, %v1677_v47  ;;  %v1957_v48 = vrot.slane %v1952_v46, %v84_v25  ;;  %v2858_v25 = vld [vmem:[%s3545_s13 + $0x8] sm:$0xff]  }
 0x584   :  { %v1671_v51 = vpop.f32.mrb[42].mxu1  ;;  %2720 = vmatprep.mubr.msk.bf16.mxu0 %vm2936_vm1, %v2935_v8  ;;  %2713 = vmatpush3.bf16.msra.mxu0 %v2849_v21 }
 0x585   :  { %v1678_v52 = vpack.c.bf16 %v1671_v51, %v1668_v49  ;;  %v2679_v53 = vpop.f32.mrb[43].mxu1  ;;  %2714 = vmatprep.subr.bf16.mxu0 %v2935_v8 }
 0x587   :  { %2709 = vmatmul.mubr.msk.bf16.vlgmr.msra.gmra.mrb[48].mxu1 %vm677_vm2, %v1678_v52 }
 0x588   :  { %2732 = vmatprep.mubr.msk.bf16.mxu1 %vm2936_vm1, %v2935_v8  ;;  %2725 = vmatpush3.bf16.msra.mxu1 %v2850_v36 }
 0x589   :  { %2726 = vmatprep.subr.bf16.mxu1 %v2935_v8  ;;  %2715 = vmatpush3.bf16.msra.mxu0 %v2851_v41 }
 0x58a   :  { %2716 = vmatprep.subr.bf16.mxu0 %v2935_v8 }
 0x58c   :  { %2727 = vmatpush3.bf16.msra.mxu1 %v2852_v42 }
 0x58d   :  { %2728 = vmatprep.subr.bf16.mxu1 %v2935_v8  ;;  %2717 = vmatpush3.bf16.msra.mxu0 %v2853_v43 }
 0x58e   :  { %2718 = vmatprep.subr.bf16.mxu0 %v2935_v8 }
 0x590   :  { %2729 = vmatpush3.bf16.msra.mxu1 %v2854_v44 }
 0x591   :  { %2730 = vmatprep.subr.bf16.mxu1 %v2935_v8  ;;  %2719 = vmatpush3.bf16.msra.mxu0 %v2855_v17 }
 0x592   :  { %2736 = vmatprep.subr.bf16.mxu0 %v2935_v8 }
 0x594   :  { %2731 = vmatpush3.bf16.msra.mxu1 %v2856_v28 }
 0x638   :  { %v1744_v54 = vpop.f32.mrb[36].mxu0 }
 0x639   :  { %v2686_v55 = vpop.f32.mrb[37].mxu0  ;;  %v1919_v59 = vsel %vm64_vm0, %v1744_v54, 0.0 }
 0x63a   :  { %v1747_v56 = vpop.f32.mrb[38].mxu0  ;;  %v2859_v55 = vld [vmem:[%s3545_s13 + $0x10] sm:$0xff]  }
 0x63b   :  { %v2687_v57 = vpop.f32.mrb[39].mxu0  ;;  %v1926_v0 = vsel %vm64_vm0, %v1747_v56, 0.0  ;;  %v2860_v56 = vld [vmem:[%s3545_s13 + $0x18] sm:$0xff]  }
 0x63c   :  { %v1800_v58 = vpop.f32.mrb[44].mxu1  ;;  %v2861_v57 = vld [vmem:[%s3545_s13 + $0x20] sm:$0xff]  }
 0x63d   :  { %v1920_v60 = vsel %vm64_vm0, %v1800_v58, 0.0  ;;  %v2694_v61 = vpop.f32.mrb[45].mxu1  ;;  %v2862_v58 = vld [vmem:[%s3545_s13 + $0x28] sm:$0xff]  }
 0x63e   :  { %v1921_v62 = vadd.f32 %v1920_v60, %v1919_v59  ;;  %v1803_v63 = vpop.f32.mrb[46].mxu1  ;;  %v2863_v59 = vld [vmem:[%s3545_s13 + $0x30] sm:$0xff]   ;;  %v2864_v60 = vld [vmem:[%s3545_s13 + $0x38] sm:$0xff]   ;;  %s2937_s13 = smov [#allocation2]  }
 0x63f   :  { %v1927_v2 = vsel %vm64_vm0, %v1803_v63, 0.0  ;;  %v2695_v3 = vpop.f32.mrb[47].mxu1  ;;  %s2246_s26 = sshll.u32 %s2937_s13, 4  ;;  %s2247_s26 = int_to_ptr.vmem [resolvable:$true] %s2246_s26 }
 0x640   :  { %v1928_v4 = vadd.f32 %v1927_v2, %v1926_v0  ;;  %s2911_s3 = scalar_lea.vmem %s2247_s26, 256  ;;  %p2916_p1 = scmp.lt.s32.totalorder %s2247_s26, %s2247_s26 }
 0x641   :  { %p2912_p0 = scmp.ne.s32.totalorder %s2247_s26, %s2911_s3  ;;  %p2917_p2 = scmp.lt.s32.totalorder %s2911_s3, %s2911_s3 }
 0x643   :  { %p2918_p3 = por %p2917_p2, %p2916_p1 }
 0x645   :  { %p2919_p4 = pnand %p2918_p3, %p2912_p0 }
 0x656   :  { %v1856_v5 = vpop.f32.mrb[40].mxu0 }
 0x657   :  { %v1922_v6 = vsel %vm64_vm0, %v1856_v5, 0.0  ;;  %v2702_v1 = vpop.f32.mrb[41].mxu0 }
 0x658   :  { %v1923_v7 = vadd.f32 %v1922_v6, %v1921_v62  ;;  %v1859_v11 = vpop.f32.mrb[42].mxu0 }
 0x659   :  { %v1929_v12 = vsel %vm64_vm0, %v1859_v11, 0.0  ;;  %v2703_v15 = vpop.f32.mrb[43].mxu0 }
 0x65a   :  { %v1930_v16 = vadd.f32 %v1929_v12, %v1928_v4  ;;  %v1912_v18 = vpop.f32.mrb[48].mxu1 }
 0x65b   :  { %v1924_v13 = vsel %vm64_vm0, %v1912_v18, 0.0  ;;  %v2710_v14 = vpop.f32.mrb[49].mxu1 }
 0x65c   :  { %v1925_v9 = vadd.f32 %v1924_v13, %v1923_v7  ;;  %v1915_v10 = vpop.f32.mrb[50].mxu1 }
 0x65d   :  { %v1931_v19 = vsel %vm64_vm0, %v1915_v10, 0.0  ;;  %v2711_v35 = vpop.f32.mrb[51].mxu1 }
 0x65e   :  { %v3430_v23 = vadd.f32 %v2909_v20, %v1925_v9  ;;  %v1932_v26 = vadd.f32 %v1931_v19, %v1930_v16 }
 0x660   :  { %v3435_v29 = vadd.f32 %v2910_v27, %v1932_v26  ;;  %v1936_v31 = vmul.f32 %v3430_v23, %v3430_v23 }
 0x662   :  { %v1938_v32 = vsel %vm64_vm0, %v1936_v31, 0.0  ;;  %v1937_v33 = vmul.f32 %v3435_v29, %v3435_v29 }
 0x663   :  { %1939 = vadd.xlane.f32.xlu0 %v1938_v32 }
 0x664   :  { %v1941_v34 = vsel %vm64_vm0, %v1937_v33, 0.0 }
 0x665   :  { %1942 = vadd.xlane.f32.xlu1 %v1941_v34 }
 0x6f0   :  { %v1940_v30 = vpop.xlane.xlu0 %1939 }
 0x6f1   :  { %v1944_v37 = vmul.f32 0.015625, %v1940_v30 }
 0x6f2   :  { %v1943_v38 = vpop.xlane.xlu1 %1942 }
 0x6f3   :  { %v1946_v39 = vadd.f32 1e-06, %v1944_v37  ;;  %v1945_v24 = vmul.f32 0.015625, %v1943_v38 }
 0x6f5   :  { %2901 = vrsqrt.f32 %v1946_v39  ;;  %v1947_v40 = vadd.f32 1e-06, %v1945_v24 }
 0x6f7   :  { %2903 = vrsqrt.f32 %v1947_v40 }
 0x6ff   :  { %v2902_v47 = vpop.eup %2901 }
 0x700   :  { %v1950_v49 = vmul.f32 %v2902_v47, %v3430_v23 }
 0x701   :  { %v2904_v50 = vpop.eup %2903 }
 0x702   :  { %v1951_v51 = vmul.f32 %v2904_v50, %v3435_v29  ;;  %v1959_v52 = vmul.f32 %v1957_v48, %v1950_v49 }
 0x704   :  { %v1960_v53 = vmul.f32 %v1957_v48, %v1951_v51 }
 0x706   :  { %v1961_v54 = vpack.c.bf16 %v1960_v53, %v1959_v52 }
 0x708   :  { %2721 = vmatmul.mubr.msk.bf16.vlgmr.msra.gmra.mrb[44].mxu0 %vm64_vm0, %v1961_v54  ;;  %2733 = vmatmul.mubr.msk.bf16.vlgmr.msra.gmra.mrb[52].mxu1 %vm64_vm0, %v1961_v54 }
 0x709   :  { %2752 = vmatprep.mubr.msk.bf16.mxu0 %vm2936_vm1, %v2935_v8  ;;  %2737 = vmatpush3.bf16.msra.mxu0 %v2857_v22 }
 0x70a   :  { %2738 = vmatprep.subr.bf16.mxu0 %v2935_v8 }
 0x70d   :  { %2739 = vmatpush3.bf16.msra.mxu0 %v2858_v25 }
 0x70e   :  { %2740 = vmatprep.subr.bf16.mxu0 %v2935_v8 }
 0x711   :  { %2741 = vmatpush3.bf16.msra.mxu0 %v2859_v55 }
 0x712   :  { %2742 = vmatprep.subr.bf16.mxu0 %v2935_v8 }
 0x715   :  { %2743 = vmatpush3.bf16.msra.mxu0 %v2860_v56 }
 0x716   :  { %2744 = vmatprep.subr.bf16.mxu0 %v2935_v8 }
 0x719   :  { %2745 = vmatpush3.bf16.msra.mxu0 %v2861_v57 }
 0x71a   :  { %2746 = vmatprep.subr.bf16.mxu0 %v2935_v8 }
 0x71d   :  { %2747 = vmatpush3.bf16.msra.mxu0 %v2862_v58 }
 0x71e   :  { %2748 = vmatprep.subr.bf16.mxu0 %v2935_v8 }
 0x721   :  { %2749 = vmatpush3.bf16.msra.mxu0 %v2863_v59 }
 0x722   :  { %2750 = vmatprep.subr.bf16.mxu0 %v2935_v8 }
 0x725   :  { %2751 = vmatpush3.bf16.msra.mxu0 %v2864_v60 }
 0x7db   :  { %v2031_v61 = vpop.f32.mrb[44].mxu0  ;;  %v2104_v62 = vpop.f32.mrb[52].mxu1 }
 0x7dc   :  { %v2113_v63 = vmul.f32 0.044715, %v2031_v61  ;;  %v2722_v0 = vpop.f32.mrb[45].mxu0  ;;  %v2734_v2 = vpop.f32.mrb[53].mxu1  ;;  %v2111_v9 = vmul.f32 0.5, %v2031_v61 }
 0x7dd   :  { %v2034_v3 = vpop.f32.mrb[46].mxu0  ;;  %v2107_v4 = vpop.f32.mrb[54].mxu1 }
 0x7de   :  { %v2115_v5 = vmul.f32 %v2113_v63, %v2031_v61  ;;  %v2114_v6 = vmul.f32 0.044715, %v2034_v3  ;;  %v2723_v1 = vpop.f32.mrb[47].mxu0  ;;  %v2735_v7 = vpop.f32.mrb[55].mxu1  ;;  %v2112_v20 = vmul.f32 0.5, %v2034_v3 }
 0x7e0   :  { %v2117_v11 = vmul.f32 %v2115_v5, %v2031_v61  ;;  %v2116_v12 = vmul.f32 %v2114_v6, %v2034_v3 }
 0x7e2   :  { %v2119_v15 = vadd.f32 %v2117_v11, %v2031_v61  ;;  %v2118_v8 = vmul.f32 %v2116_v12, %v2034_v3 }
 0x7e4   :  { %v2121_v16 = vmul.f32 0.7978846, %v2119_v15  ;;  %v2120_v18 = vadd.f32 %v2118_v8, %v2034_v3 }
 0x7e6   :  { %2905 = vtanh.f32 %v2121_v16  ;;  %v2122_v13 = vmul.f32 0.7978846, %v2120_v18 }
 0x7e8   :  { %2907 = vtanh.f32 %v2122_v13 }
 0x7f0   :  { %v2906_v14 = vpop.eup %2905 }
 0x7f1   :  { %v2125_v10 = vadd.f32 1.0, %v2906_v14 }
 0x7f2   :  { %v2908_v19 = vpop.eup %2907 }
 0x7f3   :  { %v2127_v35 = vmul.f32 %v2125_v10, %v2111_v9  ;;  %v2126_v26 = vadd.f32 1.0, %v2908_v19 }
 0x7f5   :  { %v2129_v27 = vmul.f32 %v2127_v35, %v2104_v62  ;;  %v2128_v31 = vmul.f32 %v2126_v26, %v2112_v20 }
 0x7f7   :  { %v2130_v32 = vmul.f32 %v2128_v31, %v2107_v4 }
 0x7f9   :  { %v2131_v33 = vpack.c.bf16 %v2130_v32, %v2129_v27 }
 0x7fb   :  { %2753 = vmatmul.mubr.bf16.vlgmr.msra.gmra.mrb[48].mxu0 %v2131_v33 }
 0x8ce   :  { %v2230_v34 = vpop.f32.mrb[48].mxu0 }
 0x8cf   :  { %v2237_v21 = vadd.f32 %v2230_v34, %v3430_v23  ;;  %v2754_v36 = vpop.f32.mrb[49].mxu0 }
 0x8d0   :  { %v2233_v41 = vpop.f32.mrb[50].mxu0 }
 0x8d1   :  { %2239 = vst.msk [vmem:[#allocation2] sm:$0xff] %vm64_vm0, %v2237_v21  ;;  %v2238_v42 = vadd.f32 %v2233_v41, %v3435_v29  ;;  %v2755_v43 = vpop.f32.mrb[51].mxu0 }
 0x8d3   :  { %2240 = vst.msk [vmem:[#allocation2 + $0x8] sm:$0xff] %vm64_vm0, %v2238_v42 }
 0x8d4   :  { %2922 = shalt.err (!%p2919_p4)
}
 0x8d5   :  { %s2923_s29 = scalar_lea.hbm %s3546_s14, 256 }
 0x8d6   :  { %p2924_p5 = scmp.ne.s32.totalorder %s3546_s14, %s2923_s29  ;;  %p2927_p6 = scmp.lt.u32.totalorder %s2923_s29, %s3546_s14 }
 0x8d8   :  { %p2929_p7 = pnand %p2927_p6, %p2924_p5 }
 0x8da   :  { %2932 = shalt.err (!%p2929_p7)
}
 0x8db   :  { %s2938_s8 = smov 128   ;;  %s2939_s18 = smov 8  }
 0x8dc   :  { %2252 = dma.vmem_to_hbm [thread:$0]  %s2247_s26, 256, %s3546_s14, [#allocation3], %s2938_s8, %s2938_s8, %s2939_s18  }
 0x8dd   :  { %2933 = dma.done.wait [#allocation3], 256  }
 0x8de   :  { %2934 = vsyncadd [#allocation3], 4294967040 }
 0x8df   :  { %2256 = vsyncpa [#allocation3], 1 }

</bundles_post_ra>
